<compile_context>
chip_gen: v7x
topology: tpu7x:2x2x1
jax: 0.10.0
libtpu: 0.0.40
codegen_flags: <defaults>
</compile_context>

<pallas_src>
import jax
import jax.numpy as jnp
import numpy as np
from functools import partial
from jax.experimental import pallas as pl
from jax.experimental.pallas import tpu as pltpu


def _encoder_kernel(x_ref, w_ih_ref, w_hh_ref, b_ref, w_fc_ref, b_fc_ref,
                    y_ref, xproj_scr, h_all_scr,
                    *, seq_len, batch_pad, hidden_size):
    """Fused: hoisted input projection + T-step LSTM recurrence + hoisted fc1.

    Gate packing is (i, f, o, g): sigmoid applies to one contiguous 3H slice,
    tanh to the last H slice.
    """
    T, Bp, H = seq_len, batch_pad, hidden_size

    # (1) Hoisted input projection: one big bf16 MXU matmul over all time steps,
    #     accumulated in f32.  xproj[t*Bp:(t+1)*Bp, :] = x_t @ W_ih^T + (b_ih+b_hh)
    xproj_scr[...] = (
        jnp.dot(x_ref[...], w_ih_ref[...], preferred_element_type=jnp.float32)
        + b_ref[...])

    w_hh = w_hh_ref[...]  # bf16, hoisted out of the recurrence loop

    # (2) Sequential LSTM recurrence.  Carry: (h in bf16 for the MXU, c in f32).
    def step(t, carry):
        h, c = carry
        row = pl.multiple_of(t * Bp, Bp)
        gates = (xproj_scr[pl.ds(row, Bp), :]
                 + jnp.dot(h, w_hh, preferred_element_type=jnp.float32))
        # (i, f, o, g) packing -> 1 wide sigmoid + 1 tanh per step.
        sig = jax.nn.sigmoid(gates[:, :3 * H])
        g_g = jnp.tanh(gates[:, 3 * H:])
        i_g = sig[:, 0 * H:1 * H]
        f_g = sig[:, 1 * H:2 * H]
        o_g = sig[:, 2 * H:3 * H]
        c_new = f_g * c + i_g * g_g
        h_new_f32 = o_g * jnp.tanh(c_new)
        h_new = h_new_f32.astype(jnp.bfloat16)
        h_all_scr[pl.ds(row, Bp), :] = h_new
        return (h_new, c_new)

    h0 = jnp.zeros((Bp, H), jnp.bfloat16)
    c0 = jnp.zeros((Bp, H), jnp.float32)
    unroll = True if T <= 32 else 8  # full unroll only for short sequences
    jax.lax.fori_loop(0, T, step, (h0, c0), unroll=unroll)

    # (3) Hoisted fc1: one big matmul + a single writeback of all T*Bp rows.
    y_ref[...] = (
        jnp.dot(h_all_scr[...], w_fc_ref[...], preferred_element_type=jnp.float32)
        + b_fc_ref[...]).astype(y_ref.dtype)


def encoder_forward(x, params, *, seq_len=20):
    """Mirrors Encoder.forward: optional reshape for non-3D input, LSTM, Linear.

    x: (T, B, I) = (seq_len, batch, input_size), PyTorch nn.LSTM default layout.
    returns (T, B, O).
    """
    # TODO(synk): GRU branch (sequence != 'LSTM') not implemented; default LSTM path only.
    if x.ndim != 3:
        # Mirrors the PyTorch module exactly (hard-coded 20, then seq_len slice).
        assert seq_len <= 20, "non-3D input branch assumes seq_len <= 20"
        x = x.reshape(-1, 20, x.shape[1])
        x = x[:, :seq_len, :]
        x = jnp.transpose(x, (1, 0, 2))

    T, B, I = x.shape
    H = params["w_hh_T"].shape[0]
    O = params["w_fc_T"].shape[1]

    # Pad batch to a multiple of 16 sublanes (bf16 packs 16 sublanes / vreg);
    # padded rows never mix with real rows and are sliced off at the end.
    Bp = max(16, ((B + 15) // 16) * 16)
    if Bp != B:
        x = jnp.pad(x, ((0, 0), (0, Bp - B), (0, 0)))

    # bf16 matmul inputs, f32 accumulation / gate math / biases / output.
    x2d = x.reshape(T * Bp, I).astype(jnp.bfloat16)
    w_ih = params["w_ih_T"].astype(jnp.bfloat16)
    w_hh = params["w_hh_T"].astype(jnp.bfloat16)
    w_fc = params["w_fc_T"].astype(jnp.bfloat16)
    b_sum = params["b_sum"]
    b_fc = params["b_fc"]

    kernel = partial(_encoder_kernel, seq_len=T, batch_pad=Bp, hidden_size=H)

    def run(single_buffered):
        def spec(shape):
            idx_map = lambda *_: (0,) * len(shape)
            if single_buffered:
                # grid=(1,): double-buffering the full-array blocks is wasted VMEM.
                return pl.BlockSpec(shape, idx_map, pipeline_mode=pl.Buffered(1))
            return pl.BlockSpec(shape, idx_map)

        return pl.pallas_call(
            kernel,
            out_shape=jax.ShapeDtypeStruct((T * Bp, O), jnp.float32),
            grid_spec=pltpu.PrefetchScalarGridSpec(
                num_scalar_prefetch=0,
                grid=(1,),  # everything resident in VMEM; recurrence loops in-kernel
                in_specs=[
                    spec((T * Bp, I)),
                    spec((I, 4 * H)),
                    spec((H, 4 * H)),
                    spec((1, 4 * H)),
                    spec((H, O)),
                    spec((1, O)),
                ],
                out_specs=spec((T * Bp, O)),
                scratch_shapes=[
                    pltpu.VMEM((T * Bp, 4 * H), jnp.float32),   # hoisted x projection
                    pltpu.VMEM((T * Bp, H), jnp.bfloat16),      # all hidden states
                ],
            ),
            compiler_params=pltpu.CompilerParams(
                dimension_semantics=("arbitrary",),
            ),
        )(x2d, w_ih, w_hh, b_sum, w_fc, b_fc)

    try:
        y2d = run(True)
    except Exception:
        # pipeline_mode / Buffered(1) unsupported in this jax build -> default buffering.
        y2d = run(False)

    return y2d.reshape(T, Bp, O)[:, :B, :]


def pack_params(w_ih, w_hh, b_ih, b_hh, w_fc, b_fc):
    """Pack PyTorch-layout LSTM/Linear params for the kernel.

    PyTorch packs the 4H gate rows as (i, f, g, o); we permute to (i, f, o, g)
    so sigmoid covers one contiguous 3H slice and tanh covers the last H.
    """
    H = w_hh.shape[1]

    def perm(a):  # (4H, ...) rows: (i, f, g, o) -> (i, f, o, g)
        return jnp.concatenate([a[:2 * H], a[3 * H:4 * H], a[2 * H:3 * H]], axis=0)

    return {
        "w_ih_T": perm(w_ih).T,                       # (I, 4H)
        "w_hh_T": perm(w_hh).T,                       # (H, 4H)
        "b_sum": perm(b_ih + b_hh).reshape(1, -1),    # (1, 4H)
        "w_fc_T": w_fc.T,                             # (H, O)
        "b_fc": b_fc.reshape(1, -1),                  # (1, O)
    }


def init_params(key, input_size, hidden_size, output_size):
    """Deterministic init mirroring PyTorch LSTM/Linear parameter shapes."""
    k = 1.0 / np.sqrt(hidden_size)
    keys = jax.random.split(key, 6)
    H = hidden_size
    w_ih = jax.random.uniform(keys[0], (4 * H, input_size), jnp.float32, -k, k)
    w_hh = jax.random.uniform(keys[1], (4 * H, H), jnp.float32, -k, k)
    b_ih = jax.random.uniform(keys[2], (4 * H,), jnp.float32, -k, k)
    b_hh = jax.random.uniform(keys[3], (4 * H,), jnp.float32, -k, k)
    w_fc = jax.random.uniform(keys[4], (output_size, H), jnp.float32, -k, k)
    b_fc = jax.random.uniform(keys[5], (output_size,), jnp.float32, -k, k)
    return pack_params(w_ih, w_hh, b_ih, b_hh, w_fc, b_fc)


def encoder_reference(x, params):
    """Pure-JAX f32 reference (same math, (i,f,o,g) packing) for correctness."""
    T, B, I = x.shape
    H = params["w_hh_T"].shape[0]
    h0 = jnp.zeros((B, H), jnp.float32)
    c0 = jnp.zeros((B, H), jnp.float32)

    def step(carry, x_t):
        h, c = carry
        gates = x_t @ params["w_ih_T"] + h @ params["w_hh_T"] + params["b_sum"]
        i_g = jax.nn.sigmoid(gates[:, 0 * H:1 * H])
        f_g = jax.nn.sigmoid(gates[:, 1 * H:2 * H])
        o_g = jax.nn.sigmoid(gates[:, 2 * H:3 * H])
        g_g = jnp.tanh(gates[:, 3 * H:4 * H])
        c_new = f_g * c + i_g * g_g
        h_new = o_g * jnp.tanh(c_new)
        return (h_new, c_new), h_new

    _, hs = jax.lax.scan(step, (h0, c0), x)
    return hs @ params["w_fc_T"] + params["b_fc"]


if __name__ == "__main__":
    # Small shapes consistent with the module's forward (LSTM branch).
    seq_len, batch, input_size = 8, 4, 16
    hidden_size, output_size = 32, 16

    key = jax.random.PRNGKey(0)
    kx, kp = jax.random.split(key)
    x = jax.random.normal(kx, (seq_len, batch, input_size), jnp.float32)
    params = init_params(kp, input_size, hidden_size, output_size)

    y = encoder_forward(x, params, seq_len=seq_len)
    y = jax.block_until_ready(y)

    y_ref = jax.block_until_ready(encoder_reference(x, params))
    assert y.shape == (seq_len, batch, output_size)
    # Tolerance loosened vs. the pure-f32 reference because the kernel uses
    # bf16 matmul inputs (f32 accumulation and f32 gate/cell math).
    np.testing.assert_allclose(np.asarray(y), np.asarray(y_ref), atol=3e-2, rtol=3e-2)

    print("KERNEL_OK")
</pallas_src>

<mosaic_0001>
module attributes {stable_mosaic.version = 11 : i64} {
  func.func @_encoder_kernel(%arg0: i32, %arg1: memref<128x16xbf16, #tpu.memory_space<vmem>>, %arg2: memref<16x128xbf16, #tpu.memory_space<vmem>>, %arg3: memref<32x128xbf16, #tpu.memory_space<vmem>>, %arg4: memref<1x128xf32, #tpu.memory_space<vmem>>, %arg5: memref<32x16xbf16, #tpu.memory_space<vmem>>, %arg6: memref<1x16xf32, #tpu.memory_space<vmem>>, %arg7: memref<128x16xf32, #tpu.memory_space<vmem>>, %arg8: memref<128x128xf32, #tpu.memory_space<vmem>>, %arg9: memref<128x32xbf16, #tpu.memory_space<vmem>>) attributes {dimension_semantics = [#tpu.dimension_semantics<arbitrary>], iteration_bounds = array<i64: 1>, scalar_prefetch = 0 : i64, scratch_operands = 2 : i64, tpu.core_type = #tpu.core_type<tc>, window_params = [{pipeline_mode = #tpu.pipeline_mode<synchronous>, transform_indices = @transform_0, window_bounds = array<i64: 128, 16>}, {pipeline_mode = #tpu.pipeline_mode<synchronous>, transform_indices = @transform_1, window_bounds = array<i64: 16, 128>}, {pipeline_mode = #tpu.pipeline_mode<synchronous>, transform_indices = @transform_2, window_bounds = array<i64: 32, 128>}, {pipeline_mode = #tpu.pipeline_mode<synchronous>, transform_indices = @transform_3, window_bounds = array<i64: 1, 128>}, {pipeline_mode = #tpu.pipeline_mode<synchronous>, transform_indices = @transform_4, window_bounds = array<i64: 32, 16>}, {pipeline_mode = #tpu.pipeline_mode<synchronous>, transform_indices = @transform_5, window_bounds = array<i64: 1, 16>}, {pipeline_mode = #tpu.pipeline_mode<synchronous>, transform_indices = @transform_6, window_bounds = array<i64: 128, 16>}]} {
    %c0 = arith.constant 0 : index
    %c0_0 = arith.constant 0 : index
    %0 = vector.load %arg1[%c0, %c0_0] : memref<128x16xbf16, #tpu.memory_space<vmem>>, vector<128x16xbf16>
    %c0_1 = arith.constant 0 : index
    %c0_2 = arith.constant 0 : index
    %1 = vector.load %arg2[%c0_1, %c0_2] : memref<16x128xbf16, #tpu.memory_space<vmem>>, vector<16x128xbf16>
    %cst = arith.constant dense<0.000000e+00> : vector<128x128xf32>
    %2 = tpu.matmul %0, %1, %cst {dimension_numbers = #tpu.dot_dimension_numbers<[1], [0], [0], [1], [0, 0, 1, 1], [], []>} : vector<128x16xbf16>, vector<16x128xbf16>, vector<128x128xf32> -> vector<128x128xf32>
    %c0_3 = arith.constant 0 : index
    %c0_4 = arith.constant 0 : index
    %3 = vector.load %arg4[%c0_3, %c0_4] : memref<1x128xf32, #tpu.memory_space<vmem>>, vector<1x128xf32>
    %4 = vector.broadcast %3 : vector<1x128xf32> to vector<128x128xf32>
    %5 = arith.addf %2, %4 : vector<128x128xf32>
    %c0_5 = arith.constant 0 : index
    %c0_6 = arith.constant 0 : index
    %6 = vector.load %arg8[%c0_5, %c0_6] : memref<128x128xf32, #tpu.memory_space<vmem>>, vector<128x128xf32>
    tpu.vector_store %arg8[%c0_5, %c0_6], %5 {strides = array<i32>} : memref<128x128xf32, #tpu.memory_space<vmem>>, vector<128x128xf32>,
    %c0_7 = arith.constant 0 : index
    %c0_8 = arith.constant 0 : index
    %7 = vector.load %arg3[%c0_7, %c0_8] : memref<32x128xbf16, #tpu.memory_space<vmem>>, vector<32x128xbf16>
    %cst_9 = arith.constant 0.000000e+00 : bf16
    %8 = vector.broadcast %cst_9 : bf16 to vector<16x32xbf16>
    %cst_10 = arith.constant 0.000000e+00 : f32
    %9 = vector.broadcast %cst_10 : f32 to vector<16x32xf32>
    %c0_i32 = arith.constant 0 : i32
    %c16_i32 = arith.constant 16 : i32
    %10 = arith.muli %c0_i32, %c16_i32 : i32
    %11 = tpu.assume_multiple %10, 16 : i32
    %12 = arith.index_cast %11 : i32 to index
    %c0_11 = arith.constant 0 : index
    %13 = vector.load %arg8[%12, %c0_11] : memref<128x128xf32, #tpu.memory_space<vmem>>, vector<16x128xf32>
    %cst_12 = arith.constant dense<0.000000e+00> : vector<16x128xf32>
    %14 = tpu.matmul %8, %7, %cst_12 {dimension_numbers = #tpu.dot_dimension_numbers<[1], [0], [0], [1], [0, 0, 1, 1], [], []>} : vector<16x32xbf16>, vector<32x128xbf16>, vector<16x128xf32> -> vector<16x128xf32>
    %15 = arith.addf %13, %14 : vector<16x128xf32>
    %16 = vector.extract_strided_slice %15 {offsets = [0, 0], sizes = [16, 96], strides = [1, 1]} : vector<16x128xf32> to vector<16x96xf32>
    %17 = arith.negf %16 : vector<16x96xf32>
    %18 = math.exp %17 : vector<16x96xf32>
    %cst_13 = arith.constant 1.000000e+00 : f32
    %19 = vector.broadcast %cst_13 : f32 to vector<16x96xf32>
    %20 = arith.addf %19, %18 : vector<16x96xf32>
    %21 = arith.divf %19, %20 : vector<16x96xf32>
    %22 = vector.extract_strided_slice %15 {offsets = [0, 96], sizes = [16, 32], strides = [1, 1]} : vector<16x128xf32> to vector<16x32xf32>
    %23 = math.tanh %22 : vector<16x32xf32>
    %24 = vector.extract_strided_slice %21 {offsets = [0, 0], sizes = [16, 32], strides = [1, 1]} : vector<16x96xf32> to vector<16x32xf32>
    %25 = vector.extract_strided_slice %21 {offsets = [0, 32], sizes = [16, 32], strides = [1, 1]} : vector<16x96xf32> to vector<16x32xf32>
    %26 = vector.extract_strided_slice %21 {offsets = [0, 64], sizes = [16, 32], strides = [1, 1]} : vector<16x96xf32> to vector<16x32xf32>
    %27 = arith.mulf %25, %9 : vector<16x32xf32>
    %28 = arith.mulf %24, %23 : vector<16x32xf32>
    %29 = arith.addf %27, %28 : vector<16x32xf32>
    %30 = math.tanh %29 : vector<16x32xf32>
    %31 = arith.mulf %26, %30 : vector<16x32xf32>
    %32 = arith.truncf %31 : vector<16x32xf32> to vector<16x32xbf16>
    %33 = arith.index_cast %11 : i32 to index
    %c0_14 = arith.constant 0 : index
    %34 = vector.load %arg9[%33, %c0_14] : memref<128x32xbf16, #tpu.memory_space<vmem>>, vector<16x32xbf16>
    tpu.vector_store %arg9[%33, %c0_14], %32 {strides = array<i32>} : memref<128x32xbf16, #tpu.memory_space<vmem>>, vector<16x32xbf16>,
    %c1_i32 = arith.constant 1 : i32
    %c16_i32_15 = arith.constant 16 : i32
    %35 = arith.muli %c1_i32, %c16_i32_15 : i32
    %36 = tpu.assume_multiple %35, 16 : i32
    %37 = arith.index_cast %36 : i32 to index
    %c0_16 = arith.constant 0 : index
    %38 = vector.load %arg8[%37, %c0_16] : memref<128x128xf32, #tpu.memory_space<vmem>>, vector<16x128xf32>
    %cst_17 = arith.constant dense<0.000000e+00> : vector<16x128xf32>
    %39 = tpu.matmul %32, %7, %cst_17 {dimension_numbers = #tpu.dot_dimension_numbers<[1], [0], [0], [1], [0, 0, 1, 1], [], []>} : vector<16x32xbf16>, vector<32x128xbf16>, vector<16x128xf32> -> vector<16x128xf32>
    %40 = arith.addf %38, %39 : vector<16x128xf32>
    %41 = vector.extract_strided_slice %40 {offsets = [0, 0], sizes = [16, 96], strides = [1, 1]} : vector<16x128xf32> to vector<16x96xf32>
    %42 = arith.negf %41 : vector<16x96xf32>
    %43 = math.exp %42 : vector<16x96xf32>
    %cst_18 = arith.constant 1.000000e+00 : f32
    %44 = vector.broadcast %cst_18 : f32 to vector<16x96xf32>
    %45 = arith.addf %44, %43 : vector<16x96xf32>
    %46 = arith.divf %44, %45 : vector<16x96xf32>
    %47 = vector.extract_strided_slice %40 {offsets = [0, 96], sizes = [16, 32], strides = [1, 1]} : vector<16x128xf32> to vector<16x32xf32>
    %48 = math.tanh %47 : vector<16x32xf32>
    %49 = vector.extract_strided_slice %46 {offsets = [0, 0], sizes = [16, 32], strides = [1, 1]} : vector<16x96xf32> to vector<16x32xf32>
    %50 = vector.extract_strided_slice %46 {offsets = [0, 32], sizes = [16, 32], strides = [1, 1]} : vector<16x96xf32> to vector<16x32xf32>
    %51 = vector.extract_strided_slice %46 {offsets = [0, 64], sizes = [16, 32], strides = [1, 1]} : vector<16x96xf32> to vector<16x32xf32>
    %52 = arith.mulf %50, %29 : vector<16x32xf32>
    %53 = arith.mulf %49, %48 : vector<16x32xf32>
    %54 = arith.addf %52, %53 : vector<16x32xf32>
    %55 = math.tanh %54 : vector<16x32xf32>
    %56 = arith.mulf %51, %55 : vector<16x32xf32>
    %57 = arith.truncf %56 : vector<16x32xf32> to vector<16x32xbf16>
    %58 = arith.index_cast %36 : i32 to index
    %c0_19 = arith.constant 0 : index
    %59 = vector.load %arg9[%58, %c0_19] : memref<128x32xbf16, #tpu.memory_space<vmem>>, vector<16x32xbf16>
    tpu.vector_store %arg9[%58, %c0_19], %57 {strides = array<i32>} : memref<128x32xbf16, #tpu.memory_space<vmem>>, vector<16x32xbf16>,
    %c2_i32 = arith.constant 2 : i32
    %c16_i32_20 = arith.constant 16 : i32
    %60 = arith.muli %c2_i32, %c16_i32_20 : i32
    %61 = tpu.assume_multiple %60, 16 : i32
    %62 = arith.index_cast %61 : i32 to index
    %c0_21 = arith.constant 0 : index
    %63 = vector.load %arg8[%62, %c0_21] : memref<128x128xf32, #tpu.memory_space<vmem>>, vector<16x128xf32>
    %cst_22 = arith.constant dense<0.000000e+00> : vector<16x128xf32>
    %64 = tpu.matmul %57, %7, %cst_22 {dimension_numbers = #tpu.dot_dimension_numbers<[1], [0], [0], [1], [0, 0, 1, 1], [], []>} : vector<16x32xbf16>, vector<32x128xbf16>, vector<16x128xf32> -> vector<16x128xf32>
    %65 = arith.addf %63, %64 : vector<16x128xf32>
    %66 = vector.extract_strided_slice %65 {offsets = [0, 0], sizes = [16, 96], strides = [1, 1]} : vector<16x128xf32> to vector<16x96xf32>
    %67 = arith.negf %66 : vector<16x96xf32>
    %68 = math.exp %67 : vector<16x96xf32>
    %cst_23 = arith.constant 1.000000e+00 : f32
    %69 = vector.broadcast %cst_23 : f32 to vector<16x96xf32>
    %70 = arith.addf %69, %68 : vector<16x96xf32>
    %71 = arith.divf %69, %70 : vector<16x96xf32>
    %72 = vector.extract_strided_slice %65 {offsets = [0, 96], sizes = [16, 32], strides = [1, 1]} : vector<16x128xf32> to vector<16x32xf32>
    %73 = math.tanh %72 : vector<16x32xf32>
    %74 = vector.extract_strided_slice %71 {offsets = [0, 0], sizes = [16, 32], strides = [1, 1]} : vector<16x96xf32> to vector<16x32xf32>
    %75 = vector.extract_strided_slice %71 {offsets = [0, 32], sizes = [16, 32], strides = [1, 1]} : vector<16x96xf32> to vector<16x32xf32>
    %76 = vector.extract_strided_slice %71 {offsets = [0, 64], sizes = [16, 32], strides = [1, 1]} : vector<16x96xf32> to vector<16x32xf32>
    %77 = arith.mulf %75, %54 : vector<16x32xf32>
    %78 = arith.mulf %74, %73 : vector<16x32xf32>
    %79 = arith.addf %77, %78 : vector<16x32xf32>
    %80 = math.tanh %79 : vector<16x32xf32>
    %81 = arith.mulf %76, %80 : vector<16x32xf32>
    %82 = arith.truncf %81 : vector<16x32xf32> to vector<16x32xbf16>
    %83 = arith.index_cast %61 : i32 to index
    %c0_24 = arith.constant 0 : index
    %84 = vector.load %arg9[%83, %c0_24] : memref<128x32xbf16, #tpu.memory_space<vmem>>, vector<16x32xbf16>
    tpu.vector_store %arg9[%83, %c0_24], %82 {strides = array<i32>} : memref<128x32xbf16, #tpu.memory_space<vmem>>, vector<16x32xbf16>,
    %c3_i32 = arith.constant 3 : i32
    %c16_i32_25 = arith.constant 16 : i32
    %85 = arith.muli %c3_i32, %c16_i32_25 : i32
    %86 = tpu.assume_multiple %85, 16 : i32
    %87 = arith.index_cast %86 : i32 to index
    %c0_26 = arith.constant 0 : index
    %88 = vector.load %arg8[%87, %c0_26] : memref<128x128xf32, #tpu.memory_space<vmem>>, vector<16x128xf32>
    %cst_27 = arith.constant dense<0.000000e+00> : vector<16x128xf32>
    %89 = tpu.matmul %82, %7, %cst_27 {dimension_numbers = #tpu.dot_dimension_numbers<[1], [0], [0], [1], [0, 0, 1, 1], [], []>} : vector<16x32xbf16>, vector<32x128xbf16>, vector<16x128xf32> -> vector<16x128xf32>
    %90 = arith.addf %88, %89 : vector<16x128xf32>
    %91 = vector.extract_strided_slice %90 {offsets = [0, 0], sizes = [16, 96], strides = [1, 1]} : vector<16x128xf32> to vector<16x96xf32>
    %92 = arith.negf %91 : vector<16x96xf32>
    %93 = math.exp %92 : vector<16x96xf32>
    %cst_28 = arith.constant 1.000000e+00 : f32
    %94 = vector.broadcast %cst_28 : f32 to vector<16x96xf32>
    %95 = arith.addf %94, %93 : vector<16x96xf32>
    %96 = arith.divf %94, %95 : vector<16x96xf32>
    %97 = vector.extract_strided_slice %90 {offsets = [0, 96], sizes = [16, 32], strides = [1, 1]} : vector<16x128xf32> to vector<16x32xf32>
    %98 = math.tanh %97 : vector<16x32xf32>
    %99 = vector.extract_strided_slice %96 {offsets = [0, 0], sizes = [16, 32], strides = [1, 1]} : vector<16x96xf32> to vector<16x32xf32>
    %100 = vector.extract_strided_slice %96 {offsets = [0, 32], sizes = [16, 32], strides = [1, 1]} : vector<16x96xf32> to vector<16x32xf32>
    %101 = vector.extract_strided_slice %96 {offsets = [0, 64], sizes = [16, 32], strides = [1, 1]} : vector<16x96xf32> to vector<16x32xf32>
    %102 = arith.mulf %100, %79 : vector<16x32xf32>
    %103 = arith.mulf %99, %98 : vector<16x32xf32>
    %104 = arith.addf %102, %103 : vector<16x32xf32>
    %105 = math.tanh %104 : vector<16x32xf32>
    %106 = arith.mulf %101, %105 : vector<16x32xf32>
    %107 = arith.truncf %106 : vector<16x32xf32> to vector<16x32xbf16>
    %108 = arith.index_cast %86 : i32 to index
    %c0_29 = arith.constant 0 : index
    %109 = vector.load %arg9[%108, %c0_29] : memref<128x32xbf16, #tpu.memory_space<vmem>>, vector<16x32xbf16>
    tpu.vector_store %arg9[%108, %c0_29], %107 {strides = array<i32>} : memref<128x32xbf16, #tpu.memory_space<vmem>>, vector<16x32xbf16>,
    %c4_i32 = arith.constant 4 : i32
    %c16_i32_30 = arith.constant 16 : i32
    %110 = arith.muli %c4_i32, %c16_i32_30 : i32
    %111 = tpu.assume_multiple %110, 16 : i32
    %112 = arith.index_cast %111 : i32 to index
    %c0_31 = arith.constant 0 : index
    %113 = vector.load %arg8[%112, %c0_31] : memref<128x128xf32, #tpu.memory_space<vmem>>, vector<16x128xf32>
    %cst_32 = arith.constant dense<0.000000e+00> : vector<16x128xf32>
    %114 = tpu.matmul %107, %7, %cst_32 {dimension_numbers = #tpu.dot_dimension_numbers<[1], [0], [0], [1], [0, 0, 1, 1], [], []>} : vector<16x32xbf16>, vector<32x128xbf16>, vector<16x128xf32> -> vector<16x128xf32>
    %115 = arith.addf %113, %114 : vector<16x128xf32>
    %116 = vector.extract_strided_slice %115 {offsets = [0, 0], sizes = [16, 96], strides = [1, 1]} : vector<16x128xf32> to vector<16x96xf32>
    %117 = arith.negf %116 : vector<16x96xf32>
    %118 = math.exp %117 : vector<16x96xf32>
    %cst_33 = arith.constant 1.000000e+00 : f32
    %119 = vector.broadcast %cst_33 : f32 to vector<16x96xf32>
    %120 = arith.addf %119, %118 : vector<16x96xf32>
    %121 = arith.divf %119, %120 : vector<16x96xf32>
    %122 = vector.extract_strided_slice %115 {offsets = [0, 96], sizes = [16, 32], strides = [1, 1]} : vector<16x128xf32> to vector<16x32xf32>
    %123 = math.tanh %122 : vector<16x32xf32>
    %124 = vector.extract_strided_slice %121 {offsets = [0, 0], sizes = [16, 32], strides = [1, 1]} : vector<16x96xf32> to vector<16x32xf32>
    %125 = vector.extract_strided_slice %121 {offsets = [0, 32], sizes = [16, 32], strides = [1, 1]} : vector<16x96xf32> to vector<16x32xf32>
    %126 = vector.extract_strided_slice %121 {offsets = [0, 64], sizes = [16, 32], strides = [1, 1]} : vector<16x96xf32> to vector<16x32xf32>
    %127 = arith.mulf %125, %104 : vector<16x32xf32>
    %128 = arith.mulf %124, %123 : vector<16x32xf32>
    %129 = arith.addf %127, %128 : vector<16x32xf32>
    %130 = math.tanh %129 : vector<16x32xf32>
    %131 = arith.mulf %126, %130 : vector<16x32xf32>
    %132 = arith.truncf %131 : vector<16x32xf32> to vector<16x32xbf16>
    %133 = arith.index_cast %111 : i32 to index
    %c0_34 = arith.constant 0 : index
    %134 = vector.load %arg9[%133, %c0_34] : memref<128x32xbf16, #tpu.memory_space<vmem>>, vector<16x32xbf16>
    tpu.vector_store %arg9[%133, %c0_34], %132 {strides = array<i32>} : memref<128x32xbf16, #tpu.memory_space<vmem>>, vector<16x32xbf16>,
    %c5_i32 = arith.constant 5 : i32
    %c16_i32_35 = arith.constant 16 : i32
    %135 = arith.muli %c5_i32, %c16_i32_35 : i32
    %136 = tpu.assume_multiple %135, 16 : i32
    %137 = arith.index_cast %136 : i32 to index
    %c0_36 = arith.constant 0 : index
    %138 = vector.load %arg8[%137, %c0_36] : memref<128x128xf32, #tpu.memory_space<vmem>>, vector<16x128xf32>
    %cst_37 = arith.constant dense<0.000000e+00> : vector<16x128xf32>
    %139 = tpu.matmul %132, %7, %cst_37 {dimension_numbers = #tpu.dot_dimension_numbers<[1], [0], [0], [1], [0, 0, 1, 1], [], []>} : vector<16x32xbf16>, vector<32x128xbf16>, vector<16x128xf32> -> vector<16x128xf32>
    %140 = arith.addf %138, %139 : vector<16x128xf32>
    %141 = vector.extract_strided_slice %140 {offsets = [0, 0], sizes = [16, 96], strides = [1, 1]} : vector<16x128xf32> to vector<16x96xf32>
    %142 = arith.negf %141 : vector<16x96xf32>
    %143 = math.exp %142 : vector<16x96xf32>
    %cst_38 = arith.constant 1.000000e+00 : f32
    %144 = vector.broadcast %cst_38 : f32 to vector<16x96xf32>
    %145 = arith.addf %144, %143 : vector<16x96xf32>
    %146 = arith.divf %144, %145 : vector<16x96xf32>
    %147 = vector.extract_strided_slice %140 {offsets = [0, 96], sizes = [16, 32], strides = [1, 1]} : vector<16x128xf32> to vector<16x32xf32>
    %148 = math.tanh %147 : vector<16x32xf32>
    %149 = vector.extract_strided_slice %146 {offsets = [0, 0], sizes = [16, 32], strides = [1, 1]} : vector<16x96xf32> to vector<16x32xf32>
    %150 = vector.extract_strided_slice %146 {offsets = [0, 32], sizes = [16, 32], strides = [1, 1]} : vector<16x96xf32> to vector<16x32xf32>
    %151 = vector.extract_strided_slice %146 {offsets = [0, 64], sizes = [16, 32], strides = [1, 1]} : vector<16x96xf32> to vector<16x32xf32>
    %152 = arith.mulf %150, %129 : vector<16x32xf32>
    %153 = arith.mulf %149, %148 : vector<16x32xf32>
    %154 = arith.addf %152, %153 : vector<16x32xf32>
    %155 = math.tanh %154 : vector<16x32xf32>
    %156 = arith.mulf %151, %155 : vector<16x32xf32>
    %157 = arith.truncf %156 : vector<16x32xf32> to vector<16x32xbf16>
    %158 = arith.index_cast %136 : i32 to index
    %c0_39 = arith.constant 0 : index
    %159 = vector.load %arg9[%158, %c0_39] : memref<128x32xbf16, #tpu.memory_space<vmem>>, vector<16x32xbf16>
    tpu.vector_store %arg9[%158, %c0_39], %157 {strides = array<i32>} : memref<128x32xbf16, #tpu.memory_space<vmem>>, vector<16x32xbf16>,
    %c6_i32 = arith.constant 6 : i32
    %c16_i32_40 = arith.constant 16 : i32
    %160 = arith.muli %c6_i32, %c16_i32_40 : i32
    %161 = tpu.assume_multiple %160, 16 : i32
    %162 = arith.index_cast %161 : i32 to index
    %c0_41 = arith.constant 0 : index
    %163 = vector.load %arg8[%162, %c0_41] : memref<128x128xf32, #tpu.memory_space<vmem>>, vector<16x128xf32>
    %cst_42 = arith.constant dense<0.000000e+00> : vector<16x128xf32>
    %164 = tpu.matmul %157, %7, %cst_42 {dimension_numbers = #tpu.dot_dimension_numbers<[1], [0], [0], [1], [0, 0, 1, 1], [], []>} : vector<16x32xbf16>, vector<32x128xbf16>, vector<16x128xf32> -> vector<16x128xf32>
    %165 = arith.addf %163, %164 : vector<16x128xf32>
    %166 = vector.extract_strided_slice %165 {offsets = [0, 0], sizes = [16, 96], strides = [1, 1]} : vector<16x128xf32> to vector<16x96xf32>
    %167 = arith.negf %166 : vector<16x96xf32>
    %168 = math.exp %167 : vector<16x96xf32>
    %cst_43 = arith.constant 1.000000e+00 : f32
    %169 = vector.broadcast %cst_43 : f32 to vector<16x96xf32>
    %170 = arith.addf %169, %168 : vector<16x96xf32>
    %171 = arith.divf %169, %170 : vector<16x96xf32>
    %172 = vector.extract_strided_slice %165 {offsets = [0, 96], sizes = [16, 32], strides = [1, 1]} : vector<16x128xf32> to vector<16x32xf32>
    %173 = math.tanh %172 : vector<16x32xf32>
    %174 = vector.extract_strided_slice %171 {offsets = [0, 0], sizes = [16, 32], strides = [1, 1]} : vector<16x96xf32> to vector<16x32xf32>
    %175 = vector.extract_strided_slice %171 {offsets = [0, 32], sizes = [16, 32], strides = [1, 1]} : vector<16x96xf32> to vector<16x32xf32>
    %176 = vector.extract_strided_slice %171 {offsets = [0, 64], sizes = [16, 32], strides = [1, 1]} : vector<16x96xf32> to vector<16x32xf32>
    %177 = arith.mulf %175, %154 : vector<16x32xf32>
    %178 = arith.mulf %174, %173 : vector<16x32xf32>
    %179 = arith.addf %177, %178 : vector<16x32xf32>
    %180 = math.tanh %179 : vector<16x32xf32>
    %181 = arith.mulf %176, %180 : vector<16x32xf32>
    %182 = arith.truncf %181 : vector<16x32xf32> to vector<16x32xbf16>
    %183 = arith.index_cast %161 : i32 to index
    %c0_44 = arith.constant 0 : index
    %184 = vector.load %arg9[%183, %c0_44] : memref<128x32xbf16, #tpu.memory_space<vmem>>, vector<16x32xbf16>
    tpu.vector_store %arg9[%183, %c0_44], %182 {strides = array<i32>} : memref<128x32xbf16, #tpu.memory_space<vmem>>, vector<16x32xbf16>,
    %c7_i32 = arith.constant 7 : i32
    %c16_i32_45 = arith.constant 16 : i32
    %185 = arith.muli %c7_i32, %c16_i32_45 : i32
    %186 = tpu.assume_multiple %185, 16 : i32
    %187 = arith.index_cast %186 : i32 to index
    %c0_46 = arith.constant 0 : index
    %188 = vector.load %arg8[%187, %c0_46] : memref<128x128xf32, #tpu.memory_space<vmem>>, vector<16x128xf32>
    %cst_47 = arith.constant dense<0.000000e+00> : vector<16x128xf32>
    %189 = tpu.matmul %182, %7, %cst_47 {dimension_numbers = #tpu.dot_dimension_numbers<[1], [0], [0], [1], [0, 0, 1, 1], [], []>} : vector<16x32xbf16>, vector<32x128xbf16>, vector<16x128xf32> -> vector<16x128xf32>
    %190 = arith.addf %188, %189 : vector<16x128xf32>
    %191 = vector.extract_strided_slice %190 {offsets = [0, 0], sizes = [16, 96], strides = [1, 1]} : vector<16x128xf32> to vector<16x96xf32>
    %192 = arith.negf %191 : vector<16x96xf32>
    %193 = math.exp %192 : vector<16x96xf32>
    %cst_48 = arith.constant 1.000000e+00 : f32
    %194 = vector.broadcast %cst_48 : f32 to vector<16x96xf32>
    %195 = arith.addf %194, %193 : vector<16x96xf32>
    %196 = arith.divf %194, %195 : vector<16x96xf32>
    %197 = vector.extract_strided_slice %190 {offsets = [0, 96], sizes = [16, 32], strides = [1, 1]} : vector<16x128xf32> to vector<16x32xf32>
    %198 = math.tanh %197 : vector<16x32xf32>
    %199 = vector.extract_strided_slice %196 {offsets = [0, 0], sizes = [16, 32], strides = [1, 1]} : vector<16x96xf32> to vector<16x32xf32>
    %200 = vector.extract_strided_slice %196 {offsets = [0, 32], sizes = [16, 32], strides = [1, 1]} : vector<16x96xf32> to vector<16x32xf32>
    %201 = vector.extract_strided_slice %196 {offsets = [0, 64], sizes = [16, 32], strides = [1, 1]} : vector<16x96xf32> to vector<16x32xf32>
    %202 = arith.mulf %200, %179 : vector<16x32xf32>
    %203 = arith.mulf %199, %198 : vector<16x32xf32>
    %204 = arith.addf %202, %203 : vector<16x32xf32>
    %205 = math.tanh %204 : vector<16x32xf32>
    %206 = arith.mulf %201, %205 : vector<16x32xf32>
    %207 = arith.truncf %206 : vector<16x32xf32> to vector<16x32xbf16>
    %208 = arith.index_cast %186 : i32 to index
    %c0_49 = arith.constant 0 : index
    %209 = vector.load %arg9[%208, %c0_49] : memref<128x32xbf16, #tpu.memory_space<vmem>>, vector<16x32xbf16>
    tpu.vector_store %arg9[%208, %c0_49], %207 {strides = array<i32>} : memref<128x32xbf16, #tpu.memory_space<vmem>>, vector<16x32xbf16>,
    %c8_i32 = arith.constant 8 : i32
    %c0_50 = arith.constant 0 : index
    %c0_51 = arith.constant 0 : index
    %210 = vector.load %arg9[%c0_50, %c0_51] : memref<128x32xbf16, #tpu.memory_space<vmem>>, vector<128x32xbf16>
    %c0_52 = arith.constant 0 : index
    %c0_53 = arith.constant 0 : index
    %211 = vector.load %arg5[%c0_52, %c0_53] : memref<32x16xbf16, #tpu.memory_space<vmem>>, vector<32x16xbf16>
    %cst_54 = arith.constant dense<0.000000e+00> : vector<128x16xf32>
    %212 = tpu.matmul %210, %211, %cst_54 {dimension_numbers = #tpu.dot_dimension_numbers<[1], [0], [0], [1], [0, 0, 1, 1], [], []>} : vector<128x32xbf16>, vector<32x16xbf16>, vector<128x16xf32> -> vector<128x16xf32>
    %c0_55 = arith.constant 0 : index
    %c0_56 = arith.constant 0 : index
    %213 = vector.load %arg6[%c0_55, %c0_56] : memref<1x16xf32, #tpu.memory_space<vmem>>, vector<1x16xf32>
    %214 = vector.broadcast %213 : vector<1x16xf32> to vector<128x16xf32>
    %215 = arith.addf %212, %214 : vector<128x16xf32>
    %c0_57 = arith.constant 0 : index
    %c0_58 = arith.constant 0 : index
    %216 = vector.load %arg7[%c0_57, %c0_58] : memref<128x16xf32, #tpu.memory_space<vmem>>, vector<128x16xf32>
    tpu.vector_store %arg7[%c0_57, %c0_58], %215 {strides = array<i32>} : memref<128x16xf32, #tpu.memory_space<vmem>>, vector<128x16xf32>,
    return
  }
  func.func @transform_0(%arg0: i32) -> (i32, i32) {
    %c0_i32 = arith.constant 0 : i32
    %c0_i32_0 = arith.constant 0 : i32
    %c0_i32_1 = arith.constant 0 : i32
    return %c0_i32, %c0_i32_0 : i32, i32
  }
  func.func @transform_1(%arg0: i32) -> (i32, i32) {
    %c0_i32 = arith.constant 0 : i32
    %c0_i32_0 = arith.constant 0 : i32
    %c0_i32_1 = arith.constant 0 : i32
    return %c0_i32, %c0_i32_0 : i32, i32
  }
  func.func @transform_2(%arg0: i32) -> (i32, i32) {
    %c0_i32 = arith.constant 0 : i32
    %c0_i32_0 = arith.constant 0 : i32
    %c0_i32_1 = arith.constant 0 : i32
    return %c0_i32, %c0_i32_0 : i32, i32
  }
  func.func @transform_3(%arg0: i32) -> (i32, i32) {
    %c0_i32 = arith.constant 0 : i32
    %c0_i32_0 = arith.constant 0 : i32
    %c0_i32_1 = arith.constant 0 : i32
    return %c0_i32, %c0_i32_0 : i32, i32
  }
  func.func @transform_4(%arg0: i32) -> (i32, i32) {
    %c0_i32 = arith.constant 0 : i32
    %c0_i32_0 = arith.constant 0 : i32
    %c0_i32_1 = arith.constant 0 : i32
    return %c0_i32, %c0_i32_0 : i32, i32
  }
  func.func @transform_5(%arg0: i32) -> (i32, i32) {
    %c0_i32 = arith.constant 0 : i32
    %c0_i32_0 = arith.constant 0 : i32
    %c0_i32_1 = arith.constant 0 : i32
    return %c0_i32, %c0_i32_0 : i32, i32
  }
  func.func @transform_6(%arg0: i32) -> (i32, i32) {
    %c0_i32 = arith.constant 0 : i32
    %c0_i32_0 = arith.constant 0 : i32
    %c0_i32_1 = arith.constant 0 : i32
    return %c0_i32, %c0_i32_0 : i32, i32
  }
}

module attributes {stable_mosaic.version = 11 : i64} {
  func.func @_encoder_kernel(%arg0: i32, %arg1: memref<128x16xbf16, #tpu.memory_space<vmem>>, %arg2: memref<16x128xbf16, #tpu.memory_space<vmem>>, %arg3: memref<32x128xbf16, #tpu.memory_space<vmem>>, %arg4: memref<1x128xf32, #tpu.memory_space<vmem>>, %arg5: memref<32x16xbf16, #tpu.memory_space<vmem>>, %arg6: memref<1x16xf32, #tpu.memory_space<vmem>>, %arg7: memref<128x16xf32, #tpu.memory_space<vmem>>, %arg8: memref<128x128xf32, #tpu.memory_space<vmem>>, %arg9: memref<128x32xbf16, #tpu.memory_space<vmem>>) attributes {dimension_semantics = [#tpu.dimension_semantics<arbitrary>], iteration_bounds = array<i64: 1>, scalar_prefetch = 0 : i64, scratch_operands = 2 : i64, tpu.core_type = #tpu.core_type<tc>, window_params = [{pipeline_mode = #tpu.pipeline_mode<synchronous>, transform_indices = @transform_0, window_bounds = array<i64: 128, 16>}, {pipeline_mode = #tpu.pipeline_mode<synchronous>, transform_indices = @transform_1, window_bounds = array<i64: 16, 128>}, {pipeline_mode = #tpu.pipeline_mode<synchronous>, transform_indices = @transform_2, window_bounds = array<i64: 32, 128>}, {pipeline_mode = #tpu.pipeline_mode<synchronous>, transform_indices = @transform_3, window_bounds = array<i64: 1, 128>}, {pipeline_mode = #tpu.pipeline_mode<synchronous>, transform_indices = @transform_4, window_bounds = array<i64: 32, 16>}, {pipeline_mode = #tpu.pipeline_mode<synchronous>, transform_indices = @transform_5, window_bounds = array<i64: 1, 16>}, {pipeline_mode = #tpu.pipeline_mode<synchronous>, transform_indices = @transform_6, window_bounds = array<i64: 128, 16>}]} {
    %c0 = arith.constant 0 : index
    %c0_0 = arith.constant 0 : index
    %0 = vector.load %arg1[%c0, %c0_0] : memref<128x16xbf16, #tpu.memory_space<vmem>>, vector<128x16xbf16>
    %c0_1 = arith.constant 0 : index
    %c0_2 = arith.constant 0 : index
    %1 = vector.load %arg2[%c0_1, %c0_2] : memref<16x128xbf16, #tpu.memory_space<vmem>>, vector<16x128xbf16>
    %cst = arith.constant dense<0.000000e+00> : vector<128x128xf32>
    %2 = tpu.matmul %0, %1, %cst {dimension_numbers = #tpu.dot_dimension_numbers<[1], [0], [0], [1], [0, 0, 1, 1], [], []>} : vector<128x16xbf16>, vector<16x128xbf16>, vector<128x128xf32> -> vector<128x128xf32>
    %c0_3 = arith.constant 0 : index
    %c0_4 = arith.constant 0 : index
    %3 = vector.load %arg4[%c0_3, %c0_4] : memref<1x128xf32, #tpu.memory_space<vmem>>, vector<1x128xf32>
    %4 = vector.broadcast %3 : vector<1x128xf32> to vector<128x128xf32>
    %5 = arith.addf %2, %4 : vector<128x128xf32>
    %c0_5 = arith.constant 0 : index
    %c0_6 = arith.constant 0 : index
    %6 = vector.load %arg8[%c0_5, %c0_6] : memref<128x128xf32, #tpu.memory_space<vmem>>, vector<128x128xf32>
    tpu.vector_store %arg8[%c0_5, %c0_6], %5 {strides = array<i32>} : memref<128x128xf32, #tpu.memory_space<vmem>>, vector<128x128xf32>,
    %c0_7 = arith.constant 0 : index
    %c0_8 = arith.constant 0 : index
    %7 = vector.load %arg3[%c0_7, %c0_8] : memref<32x128xbf16, #tpu.memory_space<vmem>>, vector<32x128xbf16>
    %cst_9 = arith.constant 0.000000e+00 : bf16
    %8 = vector.broadcast %cst_9 : bf16 to vector<16x32xbf16>
    %cst_10 = arith.constant 0.000000e+00 : f32
    %9 = vector.broadcast %cst_10 : f32 to vector<16x32xf32>
    %c0_i32 = arith.constant 0 : i32
    %c16_i32 = arith.constant 16 : i32
    %10 = arith.muli %c0_i32, %c16_i32 : i32
    %11 = tpu.assume_multiple %10, 16 : i32
    %12 = arith.index_cast %11 : i32 to index
    %c0_11 = arith.constant 0 : index
    %13 = vector.load %arg8[%12, %c0_11] : memref<128x128xf32, #tpu.memory_space<vmem>>, vector<16x128xf32>
    %cst_12 = arith.constant dense<0.000000e+00> : vector<16x128xf32>
    %14 = tpu.matmul %8, %7, %cst_12 {dimension_numbers = #tpu.dot_dimension_numbers<[1], [0], [0], [1], [0, 0, 1, 1], [], []>} : vector<16x32xbf16>, vector<32x128xbf16>, vector<16x128xf32> -> vector<16x128xf32>
    %15 = arith.addf %13, %14 : vector<16x128xf32>
    %16 = vector.extract_strided_slice %15 {offsets = [0, 0], sizes = [16, 96], strides = [1, 1]} : vector<16x128xf32> to vector<16x96xf32>
    %17 = arith.negf %16 : vector<16x96xf32>
    %18 = math.exp %17 : vector<16x96xf32>
    %cst_13 = arith.constant 1.000000e+00 : f32
    %19 = vector.broadcast %cst_13 : f32 to vector<16x96xf32>
    %20 = arith.addf %19, %18 : vector<16x96xf32>
    %21 = arith.divf %19, %20 : vector<16x96xf32>
    %22 = vector.extract_strided_slice %15 {offsets = [0, 96], sizes = [16, 32], strides = [1, 1]} : vector<16x128xf32> to vector<16x32xf32>
    %23 = math.tanh %22 : vector<16x32xf32>
    %24 = vector.extract_strided_slice %21 {offsets = [0, 0], sizes = [16, 32], strides = [1, 1]} : vector<16x96xf32> to vector<16x32xf32>
    %25 = vector.extract_strided_slice %21 {offsets = [0, 32], sizes = [16, 32], strides = [1, 1]} : vector<16x96xf32> to vector<16x32xf32>
    %26 = vector.extract_strided_slice %21 {offsets = [0, 64], sizes = [16, 32], strides = [1, 1]} : vector<16x96xf32> to vector<16x32xf32>
    %27 = arith.mulf %25, %9 : vector<16x32xf32>
    %28 = arith.mulf %24, %23 : vector<16x32xf32>
    %29 = arith.addf %27, %28 : vector<16x32xf32>
    %30 = math.tanh %29 : vector<16x32xf32>
    %31 = arith.mulf %26, %30 : vector<16x32xf32>
    %32 = arith.truncf %31 : vector<16x32xf32> to vector<16x32xbf16>
    %33 = arith.index_cast %11 : i32 to index
    %c0_14 = arith.constant 0 : index
    %34 = vector.load %arg9[%33, %c0_14] : memref<128x32xbf16, #tpu.memory_space<vmem>>, vector<16x32xbf16>
    tpu.vector_store %arg9[%33, %c0_14], %32 {strides = array<i32>} : memref<128x32xbf16, #tpu.memory_space<vmem>>, vector<16x32xbf16>,
    %c1_i32 = arith.constant 1 : i32
    %c16_i32_15 = arith.constant 16 : i32
    %35 = arith.muli %c1_i32, %c16_i32_15 : i32
    %36 = tpu.assume_multiple %35, 16 : i32
    %37 = arith.index_cast %36 : i32 to index
    %c0_16 = arith.constant 0 : index
    %38 = vector.load %arg8[%37, %c0_16] : memref<128x128xf32, #tpu.memory_space<vmem>>, vector<16x128xf32>
    %cst_17 = arith.constant dense<0.000000e+00> : vector<16x128xf32>
    %39 = tpu.matmul %32, %7, %cst_17 {dimension_numbers = #tpu.dot_dimension_numbers<[1], [0], [0], [1], [0, 0, 1, 1], [], []>} : vector<16x32xbf16>, vector<32x128xbf16>, vector<16x128xf32> -> vector<16x128xf32>
    %40 = arith.addf %38, %39 : vector<16x128xf32>
    %41 = vector.extract_strided_slice %40 {offsets = [0, 0], sizes = [16, 96], strides = [1, 1]} : vector<16x128xf32> to vector<16x96xf32>
    %42 = arith.negf %41 : vector<16x96xf32>
    %43 = math.exp %42 : vector<16x96xf32>
    %cst_18 = arith.constant 1.000000e+00 : f32
    %44 = vector.broadcast %cst_18 : f32 to vector<16x96xf32>
    %45 = arith.addf %44, %43 : vector<16x96xf32>
    %46 = arith.divf %44, %45 : vector<16x96xf32>
    %47 = vector.extract_strided_slice %40 {offsets = [0, 96], sizes = [16, 32], strides = [1, 1]} : vector<16x128xf32> to vector<16x32xf32>
    %48 = math.tanh %47 : vector<16x32xf32>
    %49 = vector.extract_strided_slice %46 {offsets = [0, 0], sizes = [16, 32], strides = [1, 1]} : vector<16x96xf32> to vector<16x32xf32>
    %50 = vector.extract_strided_slice %46 {offsets = [0, 32], sizes = [16, 32], strides = [1, 1]} : vector<16x96xf32> to vector<16x32xf32>
    %51 = vector.extract_strided_slice %46 {offsets = [0, 64], sizes = [16, 32], strides = [1, 1]} : vector<16x96xf32> to vector<16x32xf32>
    %52 = arith.mulf %50, %29 : vector<16x32xf32>
    %53 = arith.mulf %49, %48 : vector<16x32xf32>
    %54 = arith.addf %52, %53 : vector<16x32xf32>
    %55 = math.tanh %54 : vector<16x32xf32>
    %56 = arith.mulf %51, %55 : vector<16x32xf32>
    %57 = arith.truncf %56 : vector<16x32xf32> to vector<16x32xbf16>
    %58 = arith.index_cast %36 : i32 to index
    %c0_19 = arith.constant 0 : index
    %59 = vector.load %arg9[%58, %c0_19] : memref<128x32xbf16, #tpu.memory_space<vmem>>, vector<16x32xbf16>
    tpu.vector_store %arg9[%58, %c0_19], %57 {strides = array<i32>} : memref<128x32xbf16, #tpu.memory_space<vmem>>, vector<16x32xbf16>,
    %c2_i32 = arith.constant 2 : i32
    %c16_i32_20 = arith.constant 16 : i32
    %60 = arith.muli %c2_i32, %c16_i32_20 : i32
    %61 = tpu.assume_multiple %60, 16 : i32
    %62 = arith.index_cast %61 : i32 to index
    %c0_21 = arith.constant 0 : index
    %63 = vector.load %arg8[%62, %c0_21] : memref<128x128xf32, #tpu.memory_space<vmem>>, vector<16x128xf32>
    %cst_22 = arith.constant dense<0.000000e+00> : vector<16x128xf32>
    %64 = tpu.matmul %57, %7, %cst_22 {dimension_numbers = #tpu.dot_dimension_numbers<[1], [0], [0], [1], [0, 0, 1, 1], [], []>} : vector<16x32xbf16>, vector<32x128xbf16>, vector<16x128xf32> -> vector<16x128xf32>
    %65 = arith.addf %63, %64 : vector<16x128xf32>
    %66 = vector.extract_strided_slice %65 {offsets = [0, 0], sizes = [16, 96], strides = [1, 1]} : vector<16x128xf32> to vector<16x96xf32>
    %67 = arith.negf %66 : vector<16x96xf32>
    %68 = math.exp %67 : vector<16x96xf32>
    %cst_23 = arith.constant 1.000000e+00 : f32
    %69 = vector.broadcast %cst_23 : f32 to vector<16x96xf32>
    %70 = arith.addf %69, %68 : vector<16x96xf32>
    %71 = arith.divf %69, %70 : vector<16x96xf32>
    %72 = vector.extract_strided_slice %65 {offsets = [0, 96], sizes = [16, 32], strides = [1, 1]} : vector<16x128xf32> to vector<16x32xf32>
    %73 = math.tanh %72 : vector<16x32xf32>
    %74 = vector.extract_strided_slice %71 {offsets = [0, 0], sizes = [16, 32], strides = [1, 1]} : vector<16x96xf32> to vector<16x32xf32>
    %75 = vector.extract_strided_slice %71 {offsets = [0, 32], sizes = [16, 32], strides = [1, 1]} : vector<16x96xf32> to vector<16x32xf32>
    %76 = vector.extract_strided_slice %71 {offsets = [0, 64], sizes = [16, 32], strides = [1, 1]} : vector<16x96xf32> to vector<16x32xf32>
    %77 = arith.mulf %75, %54 : vector<16x32xf32>
    %78 = arith.mulf %74, %73 : vector<16x32xf32>
    %79 = arith.addf %77, %78 : vector<16x32xf32>
    %80 = math.tanh %79 : vector<16x32xf32>
    %81 = arith.mulf %76, %80 : vector<16x32xf32>
    %82 = arith.truncf %81 : vector<16x32xf32> to vector<16x32xbf16>
    %83 = arith.index_cast %61 : i32 to index
    %c0_24 = arith.constant 0 : index
    %84 = vector.load %arg9[%83, %c0_24] : memref<128x32xbf16, #tpu.memory_space<vmem>>, vector<16x32xbf16>
    tpu.vector_store %arg9[%83, %c0_24], %82 {strides = array<i32>} : memref<128x32xbf16, #tpu.memory_space<vmem>>, vector<16x32xbf16>,
    %c3_i32 = arith.constant 3 : i32
    %c16_i32_25 = arith.constant 16 : i32
    %85 = arith.muli %c3_i32, %c16_i32_25 : i32
    %86 = tpu.assume_multiple %85, 16 : i32
    %87 = arith.index_cast %86 : i32 to index
    %c0_26 = arith.constant 0 : index
    %88 = vector.load %arg8[%87, %c0_26] : memref<128x128xf32, #tpu.memory_space<vmem>>, vector<16x128xf32>
    %cst_27 = arith.constant dense<0.000000e+00> : vector<16x128xf32>
    %89 = tpu.matmul %82, %7, %cst_27 {dimension_numbers = #tpu.dot_dimension_numbers<[1], [0], [0], [1], [0, 0, 1, 1], [], []>} : vector<16x32xbf16>, vector<32x128xbf16>, vector<16x128xf32> -> vector<16x128xf32>
    %90 = arith.addf %88, %89 : vector<16x128xf32>
    %91 = vector.extract_strided_slice %90 {offsets = [0, 0], sizes = [16, 96], strides = [1, 1]} : vector<16x128xf32> to vector<16x96xf32>
    %92 = arith.negf %91 : vector<16x96xf32>
    %93 = math.exp %92 : vector<16x96xf32>
    %cst_28 = arith.constant 1.000000e+00 : f32
    %94 = vector.broadcast %cst_28 : f32 to vector<16x96xf32>
    %95 = arith.addf %94, %93 : vector<16x96xf32>
    %96 = arith.divf %94, %95 : vector<16x96xf32>
    %97 = vector.extract_strided_slice %90 {offsets = [0, 96], sizes = [16, 32], strides = [1, 1]} : vector<16x128xf32> to vector<16x32xf32>
    %98 = math.tanh %97 : vector<16x32xf32>
    %99 = vector.extract_strided_slice %96 {offsets = [0, 0], sizes = [16, 32], strides = [1, 1]} : vector<16x96xf32> to vector<16x32xf32>
    %100 = vector.extract_strided_slice %96 {offsets = [0, 32], sizes = [16, 32], strides = [1, 1]} : vector<16x96xf32> to vector<16x32xf32>
    %101 = vector.extract_strided_slice %96 {offsets = [0, 64], sizes = [16, 32], strides = [1, 1]} : vector<16x96xf32> to vector<16x32xf32>
    %102 = arith.mulf %100, %79 : vector<16x32xf32>
    %103 = arith.mulf %99, %98 : vector<16x32xf32>
    %104 = arith.addf %102, %103 : vector<16x32xf32>
    %105 = math.tanh %104 : vector<16x32xf32>
    %106 = arith.mulf %101, %105 : vector<16x32xf32>
    %107 = arith.truncf %106 : vector<16x32xf32> to vector<16x32xbf16>
    %108 = arith.index_cast %86 : i32 to index
    %c0_29 = arith.constant 0 : index
    %109 = vector.load %arg9[%108, %c0_29] : memref<128x32xbf16, #tpu.memory_space<vmem>>, vector<16x32xbf16>
    tpu.vector_store %arg9[%108, %c0_29], %107 {strides = array<i32>} : memref<128x32xbf16, #tpu.memory_space<vmem>>, vector<16x32xbf16>,
    %c4_i32 = arith.constant 4 : i32
    %c16_i32_30 = arith.constant 16 : i32
    %110 = arith.muli %c4_i32, %c16_i32_30 : i32
    %111 = tpu.assume_multiple %110, 16 : i32
    %112 = arith.index_cast %111 : i32 to index
    %c0_31 = arith.constant 0 : index
    %113 = vector.load %arg8[%112, %c0_31] : memref<128x128xf32, #tpu.memory_space<vmem>>, vector<16x128xf32>
    %cst_32 = arith.constant dense<0.000000e+00> : vector<16x128xf32>
    %114 = tpu.matmul %107, %7, %cst_32 {dimension_numbers = #tpu.dot_dimension_numbers<[1], [0], [0], [1], [0, 0, 1, 1], [], []>} : vector<16x32xbf16>, vector<32x128xbf16>, vector<16x128xf32> -> vector<16x128xf32>
    %115 = arith.addf %113, %114 : vector<16x128xf32>
    %116 = vector.extract_strided_slice %115 {offsets = [0, 0], sizes = [16, 96], strides = [1, 1]} : vector<16x128xf32> to vector<16x96xf32>
    %117 = arith.negf %116 : vector<16x96xf32>
    %118 = math.exp %117 : vector<16x96xf32>
    %cst_33 = arith.constant 1.000000e+00 : f32
    %119 = vector.broadcast %cst_33 : f32 to vector<16x96xf32>
    %120 = arith.addf %119, %118 : vector<16x96xf32>
    %121 = arith.divf %119, %120 : vector<16x96xf32>
    %122 = vector.extract_strided_slice %115 {offsets = [0, 96], sizes = [16, 32], strides = [1, 1]} : vector<16x128xf32> to vector<16x32xf32>
    %123 = math.tanh %122 : vector<16x32xf32>
    %124 = vector.extract_strided_slice %121 {offsets = [0, 0], sizes = [16, 32], strides = [1, 1]} : vector<16x96xf32> to vector<16x32xf32>
    %125 = vector.extract_strided_slice %121 {offsets = [0, 32], sizes = [16, 32], strides = [1, 1]} : vector<16x96xf32> to vector<16x32xf32>
    %126 = vector.extract_strided_slice %121 {offsets = [0, 64], sizes = [16, 32], strides = [1, 1]} : vector<16x96xf32> to vector<16x32xf32>
    %127 = arith.mulf %125, %104 : vector<16x32xf32>
    %128 = arith.mulf %124, %123 : vector<16x32xf32>
    %129 = arith.addf %127, %128 : vector<16x32xf32>
    %130 = math.tanh %129 : vector<16x32xf32>
    %131 = arith.mulf %126, %130 : vector<16x32xf32>
    %132 = arith.truncf %131 : vector<16x32xf32> to vector<16x32xbf16>
    %133 = arith.index_cast %111 : i32 to index
    %c0_34 = arith.constant 0 : index
    %134 = vector.load %arg9[%133, %c0_34] : memref<128x32xbf16, #tpu.memory_space<vmem>>, vector<16x32xbf16>
    tpu.vector_store %arg9[%133, %c0_34], %132 {strides = array<i32>} : memref<128x32xbf16, #tpu.memory_space<vmem>>, vector<16x32xbf16>,
    %c5_i32 = arith.constant 5 : i32
    %c16_i32_35 = arith.constant 16 : i32
    %135 = arith.muli %c5_i32, %c16_i32_35 : i32
    %136 = tpu.assume_multiple %135, 16 : i32
    %137 = arith.index_cast %136 : i32 to index
    %c0_36 = arith.constant 0 : index
    %138 = vector.load %arg8[%137, %c0_36] : memref<128x128xf32, #tpu.memory_space<vmem>>, vector<16x128xf32>
    %cst_37 = arith.constant dense<0.000000e+00> : vector<16x128xf32>
    %139 = tpu.matmul %132, %7, %cst_37 {dimension_numbers = #tpu.dot_dimension_numbers<[1], [0], [0], [1], [0, 0, 1, 1], [], []>} : vector<16x32xbf16>, vector<32x128xbf16>, vector<16x128xf32> -> vector<16x128xf32>
    %140 = arith.addf %138, %139 : vector<16x128xf32>
    %141 = vector.extract_strided_slice %140 {offsets = [0, 0], sizes = [16, 96], strides = [1, 1]} : vector<16x128xf32> to vector<16x96xf32>
    %142 = arith.negf %141 : vector<16x96xf32>
    %143 = math.exp %142 : vector<16x96xf32>
    %cst_38 = arith.constant 1.000000e+00 : f32
    %144 = vector.broadcast %cst_38 : f32 to vector<16x96xf32>
    %145 = arith.addf %144, %143 : vector<16x96xf32>
    %146 = arith.divf %144, %145 : vector<16x96xf32>
    %147 = vector.extract_strided_slice %140 {offsets = [0, 96], sizes = [16, 32], strides = [1, 1]} : vector<16x128xf32> to vector<16x32xf32>
    %148 = math.tanh %147 : vector<16x32xf32>
    %149 = vector.extract_strided_slice %146 {offsets = [0, 0], sizes = [16, 32], strides = [1, 1]} : vector<16x96xf32> to vector<16x32xf32>
    %150 = vector.extract_strided_slice %146 {offsets = [0, 32], sizes = [16, 32], strides = [1, 1]} : vector<16x96xf32> to vector<16x32xf32>
    %151 = vector.extract_strided_slice %146 {offsets = [0, 64], sizes = [16, 32], strides = [1, 1]} : vector<16x96xf32> to vector<16x32xf32>
    %152 = arith.mulf %150, %129 : vector<16x32xf32>
    %153 = arith.mulf %149, %148 : vector<16x32xf32>
    %154 = arith.addf %152, %153 : vector<16x32xf32>
    %155 = math.tanh %154 : vector<16x32xf32>
    %156 = arith.mulf %151, %155 : vector<16x32xf32>
    %157 = arith.truncf %156 : vector<16x32xf32> to vector<16x32xbf16>
    %158 = arith.index_cast %136 : i32 to index
    %c0_39 = arith.constant 0 : index
    %159 = vector.load %arg9[%158, %c0_39] : memref<128x32xbf16, #tpu.memory_space<vmem>>, vector<16x32xbf16>
    tpu.vector_store %arg9[%158, %c0_39], %157 {strides = array<i32>} : memref<128x32xbf16, #tpu.memory_space<vmem>>, vector<16x32xbf16>,
    %c6_i32 = arith.constant 6 : i32
    %c16_i32_40 = arith.constant 16 : i32
    %160 = arith.muli %c6_i32, %c16_i32_40 : i32
    %161 = tpu.assume_multiple %160, 16 : i32
    %162 = arith.index_cast %161 : i32 to index
    %c0_41 = arith.constant 0 : index
    %163 = vector.load %arg8[%162, %c0_41] : memref<128x128xf32, #tpu.memory_space<vmem>>, vector<16x128xf32>
    %cst_42 = arith.constant dense<0.000000e+00> : vector<16x128xf32>
    %164 = tpu.matmul %157, %7, %cst_42 {dimension_numbers = #tpu.dot_dimension_numbers<[1], [0], [0], [1], [0, 0, 1, 1], [], []>} : vector<16x32xbf16>, vector<32x128xbf16>, vector<16x128xf32> -> vector<16x128xf32>
    %165 = arith.addf %163, %164 : vector<16x128xf32>
    %166 = vector.extract_strided_slice %165 {offsets = [0, 0], sizes = [16, 96], strides = [1, 1]} : vector<16x128xf32> to vector<16x96xf32>
    %167 = arith.negf %166 : vector<16x96xf32>
    %168 = math.exp %167 : vector<16x96xf32>
    %cst_43 = arith.constant 1.000000e+00 : f32
    %169 = vector.broadcast %cst_43 : f32 to vector<16x96xf32>
    %170 = arith.addf %169, %168 : vector<16x96xf32>
    %171 = arith.divf %169, %170 : vector<16x96xf32>
    %172 = vector.extract_strided_slice %165 {offsets = [0, 96], sizes = [16, 32], strides = [1, 1]} : vector<16x128xf32> to vector<16x32xf32>
    %173 = math.tanh %172 : vector<16x32xf32>
    %174 = vector.extract_strided_slice %171 {offsets = [0, 0], sizes = [16, 32], strides = [1, 1]} : vector<16x96xf32> to vector<16x32xf32>
    %175 = vector.extract_strided_slice %171 {offsets = [0, 32], sizes = [16, 32], strides = [1, 1]} : vector<16x96xf32> to vector<16x32xf32>
    %176 = vector.extract_strided_slice %171 {offsets = [0, 64], sizes = [16, 32], strides = [1, 1]} : vector<16x96xf32> to vector<16x32xf32>
    %177 = arith.mulf %175, %154 : vector<16x32xf32>
    %178 = arith.mulf %174, %173 : vector<16x32xf32>
    %179 = arith.addf %177, %178 : vector<16x32xf32>
    %180 = math.tanh %179 : vector<16x32xf32>
    %181 = arith.mulf %176, %180 : vector<16x32xf32>
    %182 = arith.truncf %181 : vector<16x32xf32> to vector<16x32xbf16>
    %183 = arith.index_cast %161 : i32 to index
    %c0_44 = arith.constant 0 : index
    %184 = vector.load %arg9[%183, %c0_44] : memref<128x32xbf16, #tpu.memory_space<vmem>>, vector<16x32xbf16>
    tpu.vector_store %arg9[%183, %c0_44], %182 {strides = array<i32>} : memref<128x32xbf16, #tpu.memory_space<vmem>>, vector<16x32xbf16>,
    %c7_i32 = arith.constant 7 : i32
    %c16_i32_45 = arith.constant 16 : i32
    %185 = arith.muli %c7_i32, %c16_i32_45 : i32
    %186 = tpu.assume_multiple %185, 16 : i32
    %187 = arith.index_cast %186 : i32 to index
    %c0_46 = arith.constant 0 : index
    %188 = vector.load %arg8[%187, %c0_46] : memref<128x128xf32, #tpu.memory_space<vmem>>, vector<16x128xf32>
    %cst_47 = arith.constant dense<0.000000e+00> : vector<16x128xf32>
    %189 = tpu.matmul %182, %7, %cst_47 {dimension_numbers = #tpu.dot_dimension_numbers<[1], [0], [0], [1], [0, 0, 1, 1], [], []>} : vector<16x32xbf16>, vector<32x128xbf16>, vector<16x128xf32> -> vector<16x128xf32>
    %190 = arith.addf %188, %189 : vector<16x128xf32>
    %191 = vector.extract_strided_slice %190 {offsets = [0, 0], sizes = [16, 96], strides = [1, 1]} : vector<16x128xf32> to vector<16x96xf32>
    %192 = arith.negf %191 : vector<16x96xf32>
    %193 = math.exp %192 : vector<16x96xf32>
    %cst_48 = arith.constant 1.000000e+00 : f32
    %194 = vector.broadcast %cst_48 : f32 to vector<16x96xf32>
    %195 = arith.addf %194, %193 : vector<16x96xf32>
    %196 = arith.divf %194, %195 : vector<16x96xf32>
    %197 = vector.extract_strided_slice %190 {offsets = [0, 96], sizes = [16, 32], strides = [1, 1]} : vector<16x128xf32> to vector<16x32xf32>
    %198 = math.tanh %197 : vector<16x32xf32>
    %199 = vector.extract_strided_slice %196 {offsets = [0, 0], sizes = [16, 32], strides = [1, 1]} : vector<16x96xf32> to vector<16x32xf32>
    %200 = vector.extract_strided_slice %196 {offsets = [0, 32], sizes = [16, 32], strides = [1, 1]} : vector<16x96xf32> to vector<16x32xf32>
    %201 = vector.extract_strided_slice %196 {offsets = [0, 64], sizes = [16, 32], strides = [1, 1]} : vector<16x96xf32> to vector<16x32xf32>
    %202 = arith.mulf %200, %179 : vector<16x32xf32>
    %203 = arith.mulf %199, %198 : vector<16x32xf32>
    %204 = arith.addf %202, %203 : vector<16x32xf32>
    %205 = math.tanh %204 : vector<16x32xf32>
    %206 = arith.mulf %201, %205 : vector<16x32xf32>
    %207 = arith.truncf %206 : vector<16x32xf32> to vector<16x32xbf16>
    %208 = arith.index_cast %186 : i32 to index
    %c0_49 = arith.constant 0 : index
    %209 = vector.load %arg9[%208, %c0_49] : memref<128x32xbf16, #tpu.memory_space<vmem>>, vector<16x32xbf16>
    tpu.vector_store %arg9[%208, %c0_49], %207 {strides = array<i32>} : memref<128x32xbf16, #tpu.memory_space<vmem>>, vector<16x32xbf16>,
    %c8_i32 = arith.constant 8 : i32
    %c0_50 = arith.constant 0 : index
    %c0_51 = arith.constant 0 : index
    %210 = vector.load %arg9[%c0_50, %c0_51] : memref<128x32xbf16, #tpu.memory_space<vmem>>, vector<128x32xbf16>
    %c0_52 = arith.constant 0 : index
    %c0_53 = arith.constant 0 : index
    %211 = vector.load %arg5[%c0_52, %c0_53] : memref<32x16xbf16, #tpu.memory_space<vmem>>, vector<32x16xbf16>
    %cst_54 = arith.constant dense<0.000000e+00> : vector<128x16xf32>
    %212 = tpu.matmul %210, %211, %cst_54 {dimension_numbers = #tpu.dot_dimension_numbers<[1], [0], [0], [1], [0, 0, 1, 1], [], []>} : vector<128x32xbf16>, vector<32x16xbf16>, vector<128x16xf32> -> vector<128x16xf32>
    %c0_55 = arith.constant 0 : index
    %c0_56 = arith.constant 0 : index
    %213 = vector.load %arg6[%c0_55, %c0_56] : memref<1x16xf32, #tpu.memory_space<vmem>>, vector<1x16xf32>
    %214 = vector.broadcast %213 : vector<1x16xf32> to vector<128x16xf32>
    %215 = arith.addf %212, %214 : vector<128x16xf32>
    %c0_57 = arith.constant 0 : index
    %c0_58 = arith.constant 0 : index
    %216 = vector.load %arg7[%c0_57, %c0_58] : memref<128x16xf32, #tpu.memory_space<vmem>>, vector<128x16xf32>
    tpu.vector_store %arg7[%c0_57, %c0_58], %215 {strides = array<i32>} : memref<128x16xf32, #tpu.memory_space<vmem>>, vector<128x16xf32>,
    return
  }
  func.func @transform_0(%arg0: i32) -> (i32, i32) {
    %c0_i32 = arith.constant 0 : i32
    %c0_i32_0 = arith.constant 0 : i32
    %c0_i32_1 = arith.constant 0 : i32
    return %c0_i32, %c0_i32_0 : i32, i32
  }
  func.func @transform_1(%arg0: i32) -> (i32, i32) {
    %c0_i32 = arith.constant 0 : i32
    %c0_i32_0 = arith.constant 0 : i32
    %c0_i32_1 = arith.constant 0 : i32
    return %c0_i32, %c0_i32_0 : i32, i32
  }
  func.func @transform_2(%arg0: i32) -> (i32, i32) {
    %c0_i32 = arith.constant 0 : i32
    %c0_i32_0 = arith.constant 0 : i32
    %c0_i32_1 = arith.constant 0 : i32
    return %c0_i32, %c0_i32_0 : i32, i32
  }
  func.func @transform_3(%arg0: i32) -> (i32, i32) {
    %c0_i32 = arith.constant 0 : i32
    %c0_i32_0 = arith.constant 0 : i32
    %c0_i32_1 = arith.constant 0 : i32
    return %c0_i32, %c0_i32_0 : i32, i32
  }
  func.func @transform_4(%arg0: i32) -> (i32, i32) {
    %c0_i32 = arith.constant 0 : i32
    %c0_i32_0 = arith.constant 0 : i32
    %c0_i32_1 = arith.constant 0 : i32
    return %c0_i32, %c0_i32_0 : i32, i32
  }
  func.func @transform_5(%arg0: i32) -> (i32, i32) {
    %c0_i32 = arith.constant 0 : i32
    %c0_i32_0 = arith.constant 0 : i32
    %c0_i32_1 = arith.constant 0 : i32
    return %c0_i32, %c0_i32_0 : i32, i32
  }
  func.func @transform_6(%arg0: i32) -> (i32, i32) {
    %c0_i32 = arith.constant 0 : i32
    %c0_i32_0 = arith.constant 0 : i32
    %c0_i32_1 = arith.constant 0 : i32
    return %c0_i32, %c0_i32_0 : i32, i32
  }
}

</mosaic_0001>

<bundles_post_ra>
// kernel: tpu_custom_call.1
= control target key start
LH: loop header
LB: loop body
LE: loop exit
PB: predicated region body
PF: predicated region fallthrough
CT: control target
= control target key end

     0   :  { %vm95_vm0 = vcmask 130048   ;;  %v1599_v4 = vmov 0.0   ;;  %vm1600_vm1 = vmmov 0   ;;  %v1601_v10 = vmov 0   ;;  %s1602_s15 = smov 32   ;;  %s1975_s1 = inlined_call_operand.vmem [shape: bf16[16,128], index: 1, kind: input, shape index: {}]   ;;  %s1976_s0 = inlined_call_operand.vmem [shape: bf16[128,16], index: 0, kind: input, shape index: {}]   ;;  %s1977_s2 = inlined_call_operand.vmem [shape: bf16[32,128], index: 2, kind: input, shape index: {}]   ;;  %s1978_s3 = inlined_call_operand.vmem [shape: f32[1,128], index: 3, kind: input, shape index: {}]   ;;  %s1979_s4 = inlined_call_operand.vmem [shape: bf16[32,16], index: 4, kind: input, shape index: {}]   ;;  %s1980_s5 = inlined_call_operand.vmem [shape: f32[1,16], index: 5, kind: input, shape index: {}]   ;;  %s1981_s6 = inlined_call_operand.vmem [shape: f32[128,16], index: 6, kind: output, shape index: {}]  }
   0x1   :  { %v1458_v0 = vld [vmem:[%s1975_s1] sm:$0xff]   ;;  %v1460_v2 = vld [vmem:[%s1976_s0 + $0x28] sm:$0xff]   ;;  %v1462_v5 = vld [vmem:[%s1976_s0 + $0x30] sm:$0xff]   ;;  %vm251_vm2 = vcmask 261120  }
   0x2   :  { %v1459_v1 = vld [vmem:[%s1976_s0 + $0x20] sm:$0xff]   ;;  %1451 = vmatprep.subr.bf16.mxu1 %v1458_v0  ;;  %1349 = vmatprep.subr.bf16.mxu0 %v1458_v0  ;;  %v1663_v6 = vld [vmem:[%s1977_s2 + $0x8] sm:$0xff]   ;;  %v1463_v9 = vld [vmem:[%s1976_s0 + $0x38] sm:$0xff]  }
   0x3   :  { %1452 = vmatpush3.bf16.msra.mxu1 %v1458_v0  ;;  %1359 = vmatprep.mubr.msk.bf16.mxu1 %vm95_vm0, %v1459_v1  ;;  %v1652_v3 = vld [vmem:[%s1977_s2] sm:$0xff]   ;;  %v1466_v8 = vld [vmem:[%s1976_s0 + $0x8] sm:$0xff]  }
   0x4   :  { %1367 = vmatprep.subr.bf16.mxu1 %v1599_v4  ;;  %1350 = vmatpush3.bf16.msra.mxu0 %v1458_v0  ;;  %v1465_v7 = vld [vmem:[%s1976_s0] sm:$0xff]  }
   0x5   :  { %1399 = vmatprep.subr.bf16.mxu0 %v1599_v4  ;;  %1351 = vmatprep.mubr.msk.bf16.mxu0 %vm95_vm0, %v1465_v7  ;;  %v1717_v23 = vld [vmem:[%s1978_s3] ss:$0 sm:$0xff]  ;;  %s1603_s3 = smov 64  }
   0x6   :  { %1360 = vmatmul.mubr.msk.bf16.vlgmr.msra.gmra.mrb[0].mxu1 %vm95_vm0, %v1460_v2 }
   0x7   :  { %1368 = vmatpush3.bf16.msra.mxu1 %v1652_v3  ;;  %1363 = vmatprep.mubr.msk.bf16.mxu1 %vm95_vm0, %v1462_v5 }
   0x8   :  { %1369 = vmatprep.subr.bf16.mxu1 %v1599_v4  ;;  %1352 = vmatmul.mubr.msk.bf16.vlgmr.msra.gmra.mrb[0].mxu0 %vm95_vm0, %v1466_v8 }
   0x9   :  { %1400 = vmatpush3.bf16.msra.mxu0 %v1652_v3 }
   0xa   :  { %1401 = vmatprep.subr.bf16.mxu0 %v1599_v4 }
   0xb   :  { %1370 = vmatpush3.bf16.msra.mxu1 %v1663_v6 }
   0xc   :  { %1375 = vmatprep.subr.bf16.mxu1 %v1599_v4 }
   0xd   :  { %1402 = vmatpush3.bf16.msra.mxu0 %v1663_v6 }
   0xe   :  { %1364 = vmatmul.mubr.msk.bf16.gmra.mrb[4].mxu1 %vm95_vm0, %v1463_v9  ;;  %1415 = vmatprep.subr.bf16.mxu0 %v1599_v4 }
   0xf   :  { %1371 = vmatprep.mubr.msk.bf16.mxu1 %vm1600_vm1, %v1599_v4 }
  0x16   :  { %1372 = vmatmul.mubr.bf16.vlgmr.msra.gmra.mrb[8].mxu1 %v1601_v10 }
  0x17   :  { %1376 = vmatpush3.bf16.msra.mxu1 %v1652_v3  ;;  %1379 = vmatprep.mubr.msk.bf16.mxu1 %vm1600_vm1, %v1599_v4 }
  0x18   :  { %1377 = vmatprep.subr.bf16.mxu1 %v1599_v4 }
  0x1b   :  { %1378 = vmatpush3.bf16.msra.mxu1 %v1663_v6 }
  0x1c   :  { %1383 = vmatprep.subr.bf16.mxu1 %v1599_v4 }
  0xd9   :  { %v1694_v11 = vpop.f32.mrb[0].mxu1 }
  0xda   :  { %v1696_v12 = vpop.f32.mrb[1].mxu1 }
  0xdb   :  { %v1698_v13 = vpop.f32.mrb[2].mxu1  ;;  %v1702_v15 = vpop.f32.mrb[0].mxu0 }
  0xdc   :  { %v1700_v14 = vpop.f32.mrb[3].mxu1  ;;  %v154_v16 = vpop.f32.mrb[1].mxu0  ;;  %v163_v60 = vadd.f32 %v1702_v15, %v1717_v23 }
  0xdd   :  { %v1704_v17 = vpop.f32.mrb[2].mxu0  ;;  %v155_v24 = vadd.f32 %v1717_v23, %v154_v16 }
  0xde   :  { %v157_v18 = vpop.f32.mrb[3].mxu0  ;;  %v166_v62 = vadd.f32 %v1704_v17, %v1717_v23 }
  0xdf   :  { %v158_v26 = vadd.f32 %v1717_v23, %v157_v18 }
  0xe1   :  { %v1706_v19 = vpop.f32.mrb[4].mxu1 }
  0xe2   :  { %v1708_v20 = vpop.f32.mrb[5].mxu1 }
  0xe3   :  { %v1710_v21 = vpop.f32.mrb[6].mxu1 }
  0xe4   :  { %v1712_v22 = vpop.f32.mrb[7].mxu1 }
  0xe9   :  { %v289_v25 = vpop.f32.mrb[8].mxu1 }
  0xea   :  { %v296_v27 = vadd.f32 %v289_v25, %v155_v24  ;;  %v1373_v28 = vpop.f32.mrb[9].mxu1 }
  0xeb   :  { %v292_v29 = vpop.f32.mrb[10].mxu1 }
  0xec   :  { %1471 = vtanh.f32 %v296_v27  ;;  %v297_v30 = vadd.f32 %v292_v29, %v158_v26  ;;  %v1374_v31 = vpop.f32.mrb[11].mxu1  ;;  %v1272_v34 = vmul.f32 -1.442695, %v296_v27 }
  0xee   :  { %1473 = vtanh.f32 %v297_v30  ;;  %v1273_v35 = vmul.f32 -1.442695, %v297_v30 }
  0xef   :  { %1475 = vpow2.f32 %v1272_v34 }
  0xf0   :  { %1477 = vpow2.f32 %v1273_v35 }
  0xf6   :  { %v1472_v32 = vpop.eup %1471 }
  0xf7   :  { %316 = vrot.lane.b32.xlu0 %v1472_v32, %s1602_s15 }
  0xf8   :  { %v1474_v33 = vpop.eup %1473 }
  0xf9   :  { %v1476_v36 = vpop.eup %1475 }
  0xfa   :  { %v304_v37 = vadd.f32 1.0, %v1476_v36  ;;  %v1478_v38 = vpop.eup %1477  ;;  %v1467_v36 = vld [vmem:[%s1976_s0 + $0x10] sm:$0xff]  }
  0xfb   :  { %318 = vrot.lane.b32.xlu0 %v1474_v33, %s1602_s15  ;;  %v305_v39 = vadd.f32 1.0, %v1478_v38  ;;  %1355 = vmatprep.mubr.msk.bf16.mxu0 %vm95_vm0, %v1467_v36 }
  0xfc   :  { %1479 = vrcp.f32 %v304_v37  ;;  %v1468_v37 = vld [vmem:[%s1976_s0 + $0x18] sm:$0xff]  }
  0xfd   :  { %1481 = vrcp.f32 %v305_v39  ;;  %1356 = vmatmul.mubr.msk.bf16.gmra.mrb[4].mxu0 %vm95_vm0, %v1468_v37 }
  0xfe   :  { %1403 = vmatprep.mubr.msk.bf16.mxu0 %vm1600_vm1, %v1599_v4 }
 0x106   :  { %v1480_v40 = vpop.eup %1479 }
 0x107   :  { %v1482_v43 = vpop.eup %1481  ;;  %v312_v46 = vmul.f32 0.0, %v1480_v40 }
 0x108   :  { %v313_v49 = vmul.f32 0.0, %v1482_v43 }
 0x169   :  { %v317_v41 = vpop.permute.xlu0 %316 }
 0x16a   :  { %v322_v42 = vmul.f32 %v1480_v40, %v317_v41 }
 0x16c   :  { %326 = vrot.lane.b32.xlu1 %v322_v42, %s1602_s15 }
 0x16d   :  { %v319_v44 = vpop.permute.xlu0 %318 }
 0x16e   :  { %v323_v45 = vmul.f32 %v1482_v43, %v319_v44 }
 0x170   :  { %328 = vrot.lane.b32.xlu1 %v323_v45, %s1602_s15 }
 0x1d0   :  { %v1763_v45 = vpop.f32.mrb[4].mxu0 }
 0x1de   :  { %v327_v47 = vpop.permute.xlu1 %326 }
 0x1df   :  { %v332_v48 = vadd.f32 %v327_v47, %v312_v46  ;;  %v170_v46 = vpop.f32.mrb[5].mxu0 }
 0x1e0   :  { %v1765_v47 = vpop.f32.mrb[6].mxu0 }
 0x1e1   :  { %1483 = vtanh.f32 %v332_v48  ;;  %v182_v36 = vadd.f32 %v1765_v47, %v1717_v23 }
 0x1e2   :  { %v329_v50 = vpop.permute.xlu1 %328 }
 0x1e3   :  { %v333_v51 = vadd.f32 %v329_v50, %v313_v49  ;;  %v171_v50 = vadd.f32 %v1717_v23, %v170_v46 }
 0x1e5   :  { %1485 = vtanh.f32 %v333_v51 }
 0x1eb   :  { %v1484_v52 = vpop.eup %1483 }
 0x1ec   :  { %338 = vrot.lane.b32.xlu0 %v1484_v52, %s1602_s15 }
 0x1ef   :  { %v1486_v53 = vpop.eup %1485 }
 0x1f0   :  { %340 = vrot.lane.b32.xlu1 %v1486_v53, %s1602_s15 }
 0x25e   :  { %v339_v54 = vpop.permute.xlu0 %338 }
 0x25f   :  { %v344_v56 = vmul.f32 %v1480_v40, %v339_v54 }
 0x262   :  { %v341_v55 = vpop.permute.xlu1 %340 }
 0x263   :  { %v345_v57 = vmul.f32 %v1482_v43, %v341_v55 }
 0x265   :  { %v346_v58 = vpack.c.bf16 %v345_v57, %v344_v56 }
 0x267   :  { %348 = vrot.lane.b32.xlu0 %v346_v58, %s1603_s3 }
 0x2d9   :  { %v349_v59 = vpop.permute.xlu0 %348 }
 0x2da   :  { %351 = vst.msk [vmem:[#allocation3] sm:$0xff] %vm251_vm2, %v349_v59  ;;  %1380 = vmatmul.mubr.msk.bf16.vlgmr.msra.gmra.mrb[12].mxu1 %vm251_vm2, %v349_v59 }
 0x2db   :  { %1384 = vmatpush3.bf16.msra.mxu1 %v1652_v3  ;;  %1387 = vmatprep.mubr.msk.bf16.mxu1 %vm1600_vm1, %v1599_v4 }
 0x2dc   :  { %1385 = vmatprep.subr.bf16.mxu1 %v1599_v4 }
 0x2df   :  { %1386 = vmatpush3.bf16.msra.mxu1 %v1663_v6 }
 0x2e0   :  { %1391 = vmatprep.subr.bf16.mxu1 %v1599_v4 }
 0x3ad   :  { %v392_v61 = vpop.f32.mrb[12].mxu1 }
 0x3ae   :  { %v399_v63 = vadd.f32 %v392_v61, %v163_v60  ;;  %v1381_v0 = vpop.f32.mrb[13].mxu1 }
 0x3af   :  { %v395_v1 = vpop.f32.mrb[14].mxu1 }
 0x3b0   :  { %1487 = vtanh.f32 %v399_v63  ;;  %v400_v2 = vadd.f32 %v395_v1, %v166_v62  ;;  %v1382_v5 = vpop.f32.mrb[15].mxu1  ;;  %v1275_v9 = vmul.f32 -1.442695, %v399_v63 }
 0x3b2   :  { %1489 = vtanh.f32 %v400_v2  ;;  %v1276_v10 = vmul.f32 -1.442695, %v400_v2 }
 0x3b3   :  { %1491 = vpow2.f32 %v1275_v9 }
 0x3b4   :  { %1493 = vpow2.f32 %v1276_v10 }
 0x3ba   :  { %v1488_v7 = vpop.eup %1487 }
 0x3bb   :  { %419 = vrot.lane.b32.xlu1 %v1488_v7, %s1602_s15 }
 0x3bc   :  { %v1490_v8 = vpop.eup %1489 }
 0x3bd   :  { %421 = vrot.lane.b32.xlu0 %v1490_v8, %s1602_s15  ;;  %v1492_v15 = vpop.eup %1491 }
 0x3be   :  { %v1494_v16 = vpop.eup %1493  ;;  %v407_v17 = vadd.f32 1.0, %v1492_v15 }
 0x3bf   :  { %v408_v18 = vadd.f32 1.0, %v1494_v16 }
 0x3c0   :  { %1495 = vrcp.f32 %v407_v17 }
 0x3c1   :  { %1497 = vrcp.f32 %v408_v18 }
 0x3ca   :  { %v1496_v24 = vpop.eup %1495 }
 0x3cb   :  { %v1498_v27 = vpop.eup %1497  ;;  %v415_v30 = vmul.f32 %v1496_v24, %v332_v48  ;;  %v173_v48 = vpop.f32.mrb[7].mxu0 }
 0x3cc   :  { %v416_v33 = vmul.f32 %v1498_v27, %v333_v51  ;;  %v174_v52 = vadd.f32 %v1717_v23, %v173_v48 }
 0x42d   :  { %v420_v25 = vpop.permute.xlu1 %419 }
 0x42e   :  { %v425_v26 = vmul.f32 %v1496_v24, %v420_v25 }
 0x42f   :  { %v422_v28 = vpop.permute.xlu0 %421 }
 0x430   :  { %429 = vrot.lane.b32.xlu1 %v425_v26, %s1602_s15  ;;  %v426_v29 = vmul.f32 %v1498_v27, %v422_v28 }
 0x432   :  { %431 = vrot.lane.b32.xlu0 %v426_v29, %s1602_s15 }
 0x4a2   :  { %v430_v31 = vpop.permute.xlu1 %429 }
 0x4a3   :  { %v1744_v32 = vadd.f32 %v430_v31, %v415_v30 }
 0x4a4   :  { %v432_v34 = vpop.permute.xlu0 %431 }
 0x4a5   :  { %1499 = vtanh.f32 %v1744_v32  ;;  %v1747_v35 = vadd.f32 %v432_v34, %v416_v33  ;;  %v179_v34 = vadd.f32 %v1763_v45, %v1717_v23 }
 0x4a7   :  { %1501 = vtanh.f32 %v1747_v35 }
 0x4af   :  { %v1500_v38 = vpop.eup %1499 }
 0x4b0   :  { %441 = vrot.lane.b32.xlu1 %v1500_v38, %s1602_s15 }
 0x4b1   :  { %v1502_v39 = vpop.eup %1501 }
 0x4b2   :  { %443 = vrot.lane.b32.xlu0 %v1502_v39, %s1602_s15 }
 0x522   :  { %v442_v40 = vpop.permute.xlu1 %441 }
 0x523   :  { %v447_v42 = vmul.f32 %v1496_v24, %v442_v40 }
 0x524   :  { %v444_v41 = vpop.permute.xlu0 %443 }
 0x525   :  { %v448_v43 = vmul.f32 %v1498_v27, %v444_v41 }
 0x527   :  { %v449_v44 = vpack.c.bf16 %v448_v43, %v447_v42 }
 0x529   :  { %451 = vrot.lane.b32.xlu1 %v449_v44, %s1603_s3 }
 0x59b   :  { %v452_v49 = vpop.permute.xlu1 %451 }
 0x59c   :  { %455 = vst.msk [vmem:[#allocation3 + $0x8] sm:$0xff] %vm251_vm2, %v452_v49  ;;  %1388 = vmatmul.mubr.msk.bf16.vlgmr.msra.gmra.mrb[16].mxu1 %vm251_vm2, %v452_v49 }
 0x59d   :  { %1392 = vmatpush3.bf16.msra.mxu1 %v1652_v3  ;;  %1395 = vmatprep.mubr.msk.bf16.mxu1 %vm1600_vm1, %v1599_v4 }
 0x59e   :  { %1393 = vmatprep.subr.bf16.mxu1 %v1599_v4 }
 0x5a1   :  { %1394 = vmatpush3.bf16.msra.mxu1 %v1663_v6 }
 0x5a2   :  { %1407 = vmatprep.subr.bf16.mxu1 %v1599_v4 }
 0x66f   :  { %v496_v51 = vpop.f32.mrb[16].mxu1 }
 0x670   :  { %v503_v53 = vadd.f32 %v496_v51, %v171_v50  ;;  %v1389_v54 = vpop.f32.mrb[17].mxu1 }
 0x671   :  { %v499_v55 = vpop.f32.mrb[18].mxu1 }
 0x672   :  { %1503 = vtanh.f32 %v503_v53  ;;  %v504_v56 = vadd.f32 %v499_v55, %v174_v52  ;;  %v1390_v57 = vpop.f32.mrb[19].mxu1  ;;  %v1278_v60 = vmul.f32 -1.442695, %v503_v53 }
 0x674   :  { %1505 = vtanh.f32 %v504_v56  ;;  %v1279_v61 = vmul.f32 -1.442695, %v504_v56 }
 0x675   :  { %1507 = vpow2.f32 %v1278_v60 }
 0x676   :  { %1509 = vpow2.f32 %v1279_v61 }
 0x67c   :  { %v1504_v58 = vpop.eup %1503 }
 0x67d   :  { %523 = vrot.lane.b32.xlu0 %v1504_v58, %s1602_s15 }
 0x67e   :  { %v1506_v59 = vpop.eup %1505 }
 0x67f   :  { %525 = vrot.lane.b32.xlu1 %v1506_v59, %s1602_s15  ;;  %v1508_v62 = vpop.eup %1507 }
 0x680   :  { %v1510_v63 = vpop.eup %1509  ;;  %v511_v0 = vadd.f32 1.0, %v1508_v62 }
 0x681   :  { %v512_v1 = vadd.f32 1.0, %v1510_v63 }
 0x682   :  { %1511 = vrcp.f32 %v511_v0 }
 0x683   :  { %1513 = vrcp.f32 %v512_v1 }
 0x68c   :  { %v1512_v2 = vpop.eup %1511 }
 0x68d   :  { %v1514_v8 = vpop.eup %1513  ;;  %v519_v15 = vmul.f32 %v1512_v2, %v1744_v32 }
 0x68e   :  { %v520_v18 = vmul.f32 %v1514_v8, %v1747_v35 }
 0x6ef   :  { %v524_v5 = vpop.permute.xlu0 %523 }
 0x6f0   :  { %v529_v7 = vmul.f32 %v1512_v2, %v524_v5 }
 0x6f1   :  { %v526_v9 = vpop.permute.xlu1 %525 }
 0x6f2   :  { %533 = vrot.lane.b32.xlu0 %v529_v7, %s1602_s15  ;;  %v530_v10 = vmul.f32 %v1514_v8, %v526_v9  ;;  %v187_v9 = vadd.f32 %v1717_v23, %v1696_v12 }
 0x6f4   :  { %535 = vrot.lane.b32.xlu1 %v530_v10, %s1602_s15 }
 0x764   :  { %v534_v16 = vpop.permute.xlu0 %533 }
 0x765   :  { %v539_v17 = vadd.f32 %v534_v16, %v519_v15  ;;  %v190_v15 = vadd.f32 %v1717_v23, %v1700_v14 }
 0x766   :  { %v536_v24 = vpop.permute.xlu1 %535 }
 0x767   :  { %1515 = vtanh.f32 %v539_v17  ;;  %v540_v25 = vadd.f32 %v536_v24, %v520_v18 }
 0x769   :  { %1517 = vtanh.f32 %v540_v25 }
 0x771   :  { %v1516_v26 = vpop.eup %1515 }
 0x772   :  { %545 = vrot.lane.b32.xlu0 %v1516_v26, %s1602_s15 }
 0x773   :  { %v1518_v27 = vpop.eup %1517 }
 0x774   :  { %547 = vrot.lane.b32.xlu1 %v1518_v27, %s1602_s15 }
 0x7e4   :  { %v546_v28 = vpop.permute.xlu0 %545 }
 0x7e5   :  { %v551_v30 = vmul.f32 %v1512_v2, %v546_v28 }
 0x7e6   :  { %v548_v29 = vpop.permute.xlu1 %547 }
 0x7e7   :  { %v552_v31 = vmul.f32 %v1514_v8, %v548_v29 }
 0x7e9   :  { %v553_v33 = vpack.c.bf16 %v552_v31, %v551_v30 }
 0x7eb   :  { %555 = vrot.lane.b32.xlu0 %v553_v33, %s1603_s3 }
 0x85d   :  { %v556_v32 = vpop.permute.xlu0 %555 }
 0x85e   :  { %559 = vst.msk [vmem:[#allocation3 + $0x10] sm:$0xff] %vm251_vm2, %v556_v32  ;;  %1396 = vmatmul.mubr.msk.bf16.vlgmr.msra.gmra.mrb[20].mxu1 %vm251_vm2, %v556_v32 }
 0x85f   :  { %1408 = vmatpush3.bf16.msra.mxu1 %v1652_v3  ;;  %1411 = vmatprep.mubr.msk.bf16.mxu1 %vm1600_vm1, %v1599_v4 }
 0x860   :  { %1409 = vmatprep.subr.bf16.mxu1 %v1599_v4 }
 0x863   :  { %1410 = vmatpush3.bf16.msra.mxu1 %v1663_v6 }
 0x864   :  { %1423 = vmatprep.subr.bf16.mxu1 %v1599_v4 }
 0x931   :  { %v600_v35 = vpop.f32.mrb[20].mxu1 }
 0x932   :  { %v607_v37 = vadd.f32 %v600_v35, %v179_v34  ;;  %v1397_v38 = vpop.f32.mrb[21].mxu1 }
 0x933   :  { %v603_v39 = vpop.f32.mrb[22].mxu1 }
 0x934   :  { %1519 = vtanh.f32 %v607_v37  ;;  %v608_v40 = vadd.f32 %v603_v39, %v182_v36  ;;  %v1398_v41 = vpop.f32.mrb[23].mxu1  ;;  %v1281_v44 = vmul.f32 -1.442695, %v607_v37 }
 0x936   :  { %1521 = vtanh.f32 %v608_v40  ;;  %v1282_v46 = vmul.f32 -1.442695, %v608_v40 }
 0x937   :  { %1523 = vpow2.f32 %v1281_v44 }
 0x938   :  { %1525 = vpow2.f32 %v1282_v46 }
 0x93e   :  { %v1520_v42 = vpop.eup %1519 }
 0x93f   :  { %627 = vrot.lane.b32.xlu1 %v1520_v42, %s1602_s15 }
 0x940   :  { %v1522_v43 = vpop.eup %1521 }
 0x941   :  { %629 = vrot.lane.b32.xlu0 %v1522_v43, %s1602_s15  ;;  %v1524_v45 = vpop.eup %1523 }
 0x942   :  { %v1526_v48 = vpop.eup %1525  ;;  %v615_v47 = vadd.f32 1.0, %v1524_v45 }
 0x943   :  { %v616_v49 = vadd.f32 1.0, %v1526_v48 }
 0x944   :  { %1527 = vrcp.f32 %v615_v47 }
 0x945   :  { %1529 = vrcp.f32 %v616_v49 }
 0x94e   :  { %v1528_v50 = vpop.eup %1527 }
 0x94f   :  { %v1530_v53 = vpop.eup %1529  ;;  %v623_v56 = vmul.f32 %v1528_v50, %v539_v17 }
 0x950   :  { %v624_v59 = vmul.f32 %v1530_v53, %v540_v25 }
 0x9b1   :  { %v628_v51 = vpop.permute.xlu1 %627 }
 0x9b2   :  { %v633_v52 = vmul.f32 %v1528_v50, %v628_v51 }
 0x9b3   :  { %v630_v54 = vpop.permute.xlu0 %629 }
 0x9b4   :  { %637 = vrot.lane.b32.xlu1 %v633_v52, %s1602_s15  ;;  %v634_v55 = vmul.f32 %v1530_v53, %v630_v54  ;;  %v195_v52 = vadd.f32 %v1694_v11, %v1717_v23  ;;  %v198_v54 = vadd.f32 %v1698_v13, %v1717_v23 }
 0x9b6   :  { %639 = vrot.lane.b32.xlu0 %v634_v55, %s1602_s15 }
 0xa26   :  { %v638_v57 = vpop.permute.xlu1 %637 }
 0xa27   :  { %v643_v58 = vadd.f32 %v638_v57, %v623_v56 }
 0xa28   :  { %v640_v60 = vpop.permute.xlu0 %639 }
 0xa29   :  { %1531 = vtanh.f32 %v643_v58  ;;  %v644_v61 = vadd.f32 %v640_v60, %v624_v59 }
 0xa2b   :  { %1533 = vtanh.f32 %v644_v61 }
 0xa33   :  { %v1532_v62 = vpop.eup %1531 }
 0xa34   :  { %649 = vrot.lane.b32.xlu1 %v1532_v62, %s1602_s15 }
 0xa35   :  { %v1534_v63 = vpop.eup %1533 }
 0xa36   :  { %651 = vrot.lane.b32.xlu0 %v1534_v63, %s1602_s15 }
 0xaa6   :  { %v650_v0 = vpop.permute.xlu1 %649 }
 0xaa7   :  { %v655_v2 = vmul.f32 %v1528_v50, %v650_v0 }
 0xaa8   :  { %v652_v1 = vpop.permute.xlu0 %651 }
 0xaa9   :  { %v656_v5 = vmul.f32 %v1530_v53, %v652_v1 }
 0xaab   :  { %v657_v7 = vpack.c.bf16 %v656_v5, %v655_v2 }
 0xaad   :  { %659 = vrot.lane.b32.xlu1 %v657_v7, %s1603_s3 }
 0xb1f   :  { %v660_v8 = vpop.permute.xlu1 %659 }
 0xb20   :  { %663 = vst.msk [vmem:[#allocation3 + $0x18] sm:$0xff] %vm251_vm2, %v660_v8  ;;  %1404 = vmatmul.mubr.msk.bf16.vlgmr.msra.gmra.mrb[8].mxu0 %vm251_vm2, %v660_v8 }
 0xb21   :  { %1416 = vmatpush3.bf16.msra.mxu0 %v1652_v3  ;;  %1419 = vmatprep.mubr.msk.bf16.mxu0 %vm1600_vm1, %v1599_v4 }
 0xb22   :  { %1417 = vmatprep.subr.bf16.mxu0 %v1599_v4 }
 0xb25   :  { %1418 = vmatpush3.bf16.msra.mxu0 %v1663_v6 }
 0xbf3   :  { %v704_v10 = vpop.f32.mrb[8].mxu0 }
 0xbf4   :  { %v711_v16 = vadd.f32 %v704_v10, %v187_v9  ;;  %v1405_v17 = vpop.f32.mrb[9].mxu0 }
 0xbf5   :  { %v707_v18 = vpop.f32.mrb[10].mxu0 }
 0xbf6   :  { %1535 = vtanh.f32 %v711_v16  ;;  %v712_v24 = vadd.f32 %v707_v18, %v190_v15  ;;  %v1406_v25 = vpop.f32.mrb[11].mxu0  ;;  %v1284_v28 = vmul.f32 -1.442695, %v711_v16 }
 0xbf7   :  { %v1469_v25 = vld [vmem:[%s1979_s4] sm:$0xff]  }
 0xbf8   :  { %1537 = vtanh.f32 %v712_v24  ;;  %v1285_v29 = vmul.f32 -1.442695, %v712_v24  ;;  %1431 = vmatprep.subr.bf16.mxu0 %v1469_v25 }
 0xbf9   :  { %1539 = vpow2.f32 %v1284_v28 }
 0xbfa   :  { %1541 = vpow2.f32 %v1285_v29 }
 0xc00   :  { %v1536_v26 = vpop.eup %1535 }
 0xc01   :  { %731 = vrot.lane.b32.xlu0 %v1536_v26, %s1602_s15 }
 0xc02   :  { %v1538_v27 = vpop.eup %1537 }
 0xc03   :  { %733 = vrot.lane.b32.xlu1 %v1538_v27, %s1602_s15  ;;  %v1540_v12 = vpop.eup %1539 }
 0xc04   :  { %v1542_v30 = vpop.eup %1541  ;;  %v719_v14 = vadd.f32 1.0, %v1540_v12 }
 0xc05   :  { %v720_v31 = vadd.f32 1.0, %v1542_v30  ;;  %v1470_v30 = vld [vmem:[%s1979_s4 + $0x8] sm:$0xff]  }
 0xc06   :  { %1543 = vrcp.f32 %v719_v14 }
 0xc07   :  { %1545 = vrcp.f32 %v720_v31  ;;  %v1080_v31 = vld [vmem:[#allocation3] sm:$0xff] }
 0xc10   :  { %v1544_v33 = vpop.eup %1543 }
 0xc11   :  { %v1546_v35 = vpop.eup %1545  ;;  %v727_v38 = vmul.f32 %v1544_v33, %v643_v58 }
 0xc12   :  { %v728_v41 = vmul.f32 %v1546_v35, %v644_v61 }
 0xc73   :  { %v732_v32 = vpop.permute.xlu0 %731 }
 0xc74   :  { %v737_v34 = vmul.f32 %v1544_v33, %v732_v32  ;;  %v1082_v32 = vld [vmem:[#allocation3 + $0x10] sm:$0xff] }
 0xc75   :  { %v734_v36 = vpop.permute.xlu1 %733 }
 0xc76   :  { %741 = vrot.lane.b32.xlu0 %v737_v34, %s1602_s15  ;;  %v738_v37 = vmul.f32 %v1546_v35, %v734_v36  ;;  %v1083_v34 = vld [vmem:[#allocation3 + $0x18] sm:$0xff] }
 0xc78   :  { %743 = vrot.lane.b32.xlu1 %v738_v37, %s1602_s15  ;;  %v203_v37 = vadd.f32 %v1717_v23, %v1708_v20 }
 0xce8   :  { %v742_v39 = vpop.permute.xlu0 %741 }
 0xce9   :  { %v747_v40 = vadd.f32 %v742_v39, %v727_v38  ;;  %v206_v39 = vadd.f32 %v1717_v23, %v1712_v22 }
 0xcea   :  { %v744_v42 = vpop.permute.xlu1 %743 }
 0xceb   :  { %1547 = vtanh.f32 %v747_v40  ;;  %v748_v43 = vadd.f32 %v744_v42, %v728_v41 }
 0xced   :  { %1549 = vtanh.f32 %v748_v43 }
 0xcf5   :  { %v1548_v44 = vpop.eup %1547 }
 0xcf6   :  { %753 = vrot.lane.b32.xlu0 %v1548_v44, %s1602_s15 }
 0xcf7   :  { %v1550_v46 = vpop.eup %1549 }
 0xcf8   :  { %755 = vrot.lane.b32.xlu1 %v1550_v46, %s1602_s15  ;;  %v1868_v46 = vld [vmem:[%s1980_s5] ss:$0 sm:$0xff] }
 0xd68   :  { %v754_v45 = vpop.permute.xlu0 %753 }
 0xd69   :  { %v759_v47 = vmul.f32 %v1544_v33, %v754_v45  ;;  %v1081_v33 = vld [vmem:[#allocation3 + $0x8] sm:$0xff] }
 0xd6a   :  { %v756_v48 = vpop.permute.xlu1 %755 }
 0xd6b   :  { %v760_v49 = vmul.f32 %v1546_v35, %v756_v48 }
 0xd6d   :  { %v761_v50 = vpack.c.bf16 %v760_v49, %v759_v47 }
 0xd6f   :  { %763 = vrot.lane.b32.xlu0 %v761_v50, %s1603_s3 }
 0xde1   :  { %v764_v51 = vpop.permute.xlu0 %763 }
 0xde2   :  { %767 = vst.msk [vmem:[#allocation3 + $0x20] sm:$0xff] %vm251_vm2, %v764_v51  ;;  %1412 = vmatmul.mubr.msk.bf16.vlgmr.msra.gmra.mrb[24].mxu1 %vm251_vm2, %v764_v51 }
 0xde3   :  { %1424 = vmatpush3.bf16.msra.mxu1 %v1652_v3  ;;  %1427 = vmatprep.mubr.msk.bf16.mxu1 %vm1600_vm1, %v1599_v4 }
 0xde4   :  { %1425 = vmatprep.subr.bf16.mxu1 %v1599_v4 }
 0xde7   :  { %1426 = vmatpush3.bf16.msra.mxu1 %v1663_v6 }
 0xde9   :  { %v1084_v35 = vld [vmem:[#allocation3 + $0x20] sm:$0xff] }
 0xeb5   :  { %v808_v53 = vpop.f32.mrb[24].mxu1 }
 0xeb6   :  { %v815_v55 = vadd.f32 %v808_v53, %v195_v52  ;;  %v1413_v56 = vpop.f32.mrb[25].mxu1 }
 0xeb7   :  { %v811_v57 = vpop.f32.mrb[26].mxu1 }
 0xeb8   :  { %1551 = vtanh.f32 %v815_v55  ;;  %v816_v58 = vadd.f32 %v811_v57, %v198_v54  ;;  %v1414_v3 = vpop.f32.mrb[27].mxu1  ;;  %v1287_v6 = vmul.f32 -1.442695, %v815_v55 }
 0xeba   :  { %1553 = vtanh.f32 %v816_v58  ;;  %v1288_v60 = vmul.f32 -1.442695, %v816_v58 }
 0xebb   :  { %1555 = vpow2.f32 %v1287_v6 }
 0xebc   :  { %1557 = vpow2.f32 %v1288_v60 }
 0xec2   :  { %v1552_v59 = vpop.eup %1551 }
 0xec3   :  { %835 = vrot.lane.b32.xlu1 %v1552_v59, %s1602_s15 }
 0xec4   :  { %v1554_v4 = vpop.eup %1553 }
 0xec5   :  { %837 = vrot.lane.b32.xlu0 %v1554_v4, %s1602_s15  ;;  %v1556_v11 = vpop.eup %1555 }
 0xec6   :  { %v1558_v61 = vpop.eup %1557  ;;  %v823_v13 = vadd.f32 1.0, %v1556_v11 }
 0xec7   :  { %v824_v62 = vadd.f32 1.0, %v1558_v61 }
 0xec8   :  { %1559 = vrcp.f32 %v823_v13 }
 0xec9   :  { %1561 = vrcp.f32 %v824_v62 }
 0xed2   :  { %v1560_v63 = vpop.eup %1559 }
 0xed3   :  { %v1562_v2 = vpop.eup %1561  ;;  %v831_v8 = vmul.f32 %v1560_v63, %v747_v40 }
 0xed4   :  { %v832_v15 = vmul.f32 %v1562_v2, %v748_v43 }
 0xf35   :  { %v836_v0 = vpop.permute.xlu1 %835 }
 0xf36   :  { %v841_v1 = vmul.f32 %v1560_v63, %v836_v0 }
 0xf37   :  { %v838_v5 = vpop.permute.xlu0 %837 }
 0xf38   :  { %845 = vrot.lane.b32.xlu1 %v841_v1, %s1602_s15  ;;  %v842_v7 = vmul.f32 %v1562_v2, %v838_v5 }
 0xf3a   :  { %847 = vrot.lane.b32.xlu0 %v842_v7, %s1602_s15 }
 0xfaa   :  { %v846_v9 = vpop.permute.xlu1 %845 }
 0xfab   :  { %v1838_v10 = vadd.f32 %v846_v9, %v831_v8 }
 0xfac   :  { %v848_v16 = vpop.permute.xlu0 %847 }
 0xfad   :  { %1563 = vtanh.f32 %v1838_v10  ;;  %v1841_v17 = vadd.f32 %v848_v16, %v832_v15 }
 0xfaf   :  { %1565 = vtanh.f32 %v1841_v17 }
 0xfb7   :  { %v1564_v18 = vpop.eup %1563 }
 0xfb8   :  { %857 = vrot.lane.b32.xlu1 %v1564_v18, %s1602_s15 }
 0xfb9   :  { %v1566_v24 = vpop.eup %1565 }
 0xfba   :  { %859 = vrot.lane.b32.xlu0 %v1566_v24, %s1602_s15 }
0x102a   :  { %v858_v26 = vpop.permute.xlu1 %857 }
0x102b   :  { %v863_v28 = vmul.f32 %v1560_v63, %v858_v26 }
0x102c   :  { %v860_v27 = vpop.permute.xlu0 %859 }
0x102d   :  { %v864_v29 = vmul.f32 %v1562_v2, %v860_v27 }
0x102f   :  { %v865_v12 = vpack.c.bf16 %v864_v29, %v863_v28 }
0x1031   :  { %867 = vrot.lane.b32.xlu1 %v865_v12, %s1603_s3 }
0x10a3   :  { %v868_v14 = vpop.permute.xlu1 %867 }
0x10a4   :  { %871 = vst.msk [vmem:[#allocation3 + $0x28] sm:$0xff] %vm251_vm2, %v868_v14  ;;  %1420 = vmatmul.mubr.msk.bf16.vlgmr.msra.gmra.mrb[12].mxu0 %vm251_vm2, %v868_v14 }
0x10a5   :  { %1432 = vmatpush3.bf16.msra.mxu0 %v1469_v25  ;;  %1435 = vmatprep.mubr.msk.bf16.mxu0 %vm251_vm2, %v1080_v31 }
0x10a6   :  { %1433 = vmatprep.subr.bf16.mxu0 %v1470_v30 }
0x10a9   :  { %1434 = vmatpush3.bf16.msra.mxu0 %v1470_v30 }
0x10ab   :  { %v1085_v36 = vld [vmem:[#allocation3 + $0x28] sm:$0xff] }
0x10ac   :  { %1436 = vmatmul.mubr.msk.bf16.vlgmr.msra.gmra.mrb[16].mxu0 %vm251_vm2, %v1081_v33 }
0x10ad   :  { %1439 = vmatprep.mubr.msk.bf16.mxu0 %vm251_vm2, %v1082_v32 }
0x10b4   :  { %1440 = vmatmul.mubr.msk.bf16.gmra.mrb[20].mxu0 %vm251_vm2, %v1083_v34 }
0x10b5   :  { %1443 = vmatprep.mubr.msk.bf16.mxu0 %vm251_vm2, %v1084_v35 }
0x10bc   :  { %1444 = vmatmul.mubr.msk.bf16.gmra.mrb[24].mxu0 %vm251_vm2, %v1085_v36 }
0x1177   :  { %v912_v38 = vpop.f32.mrb[12].mxu0 }
0x1178   :  { %v919_v40 = vadd.f32 %v912_v38, %v203_v37  ;;  %v1421_v41 = vpop.f32.mrb[13].mxu0  ;;  %v211_v38 = vadd.f32 %v1706_v19, %v1717_v23 }
0x1179   :  { %v915_v42 = vpop.f32.mrb[14].mxu0 }
0x117a   :  { %1567 = vtanh.f32 %v919_v40  ;;  %v920_v43 = vadd.f32 %v915_v42, %v206_v39  ;;  %v1422_v44 = vpop.f32.mrb[15].mxu0  ;;  %v1290_v1 = vmul.f32 -1.442695, %v919_v40  ;;  %v214_v40 = vadd.f32 %v1710_v21, %v1717_v23 }
0x117c   :  { %1569 = vtanh.f32 %v920_v43  ;;  %v1291_v2 = vmul.f32 -1.442695, %v920_v43 }
0x117d   :  { %1571 = vpow2.f32 %v1290_v1 }
0x117e   :  { %1573 = vpow2.f32 %v1291_v2 }
0x117f   :  { %v1437_v45 = vpop.f32.mrb[16].mxu0 }
0x1180   :  { %v1178_v48 = vadd.f32 %v1437_v45, %v1868_v46  ;;  %v1169_v20 = vpop.f32.mrb[17].mxu0 }
0x1181   :  { %v1170_v47 = vadd.f32 %v1868_v46, %v1169_v20  ;;  %v1438_v49 = vpop.f32.mrb[18].mxu0 }
0x1182   :  { %1234 = vst.msk [vmem:[%s1981_s6 + $0x10] sm:$0xff] %vm95_vm0, %v1178_v48  ;;  %v1181_v22 = vadd.f32 %v1438_v49, %v1868_v46  ;;  %v1172_v50 = vpop.f32.mrb[19].mxu0 }
0x1183   :  { %1232 = vst.msk [vmem:[%s1981_s6] sm:$0xff] %vm95_vm0, %v1170_v47  ;;  %v1173_v51 = vadd.f32 %v1868_v46, %v1172_v50 }
0x1184   :  { %v1568_v52 = vpop.eup %1567  ;;  %1235 = vst.msk [vmem:[%s1981_s6 + $0x18] sm:$0xff] %vm95_vm0, %v1181_v22 }
0x1185   :  { %1233 = vst.msk [vmem:[%s1981_s6 + $0x8] sm:$0xff] %vm95_vm0, %v1173_v51  ;;  %939 = vrot.lane.b32.xlu0 %v1568_v52, %s1602_s15 }
0x1186   :  { %v1570_v53 = vpop.eup %1569 }
0x1187   :  { %v1441_v54 = vpop.f32.mrb[20].mxu0  ;;  %941 = vrot.lane.b32.xlu1 %v1570_v53, %s1602_s15  ;;  %v1572_v5 = vpop.eup %1571 }
0x1188   :  { %v1194_v55 = vadd.f32 %v1441_v54, %v1868_v46  ;;  %v1185_v56 = vpop.f32.mrb[21].mxu0  ;;  %v1574_v7 = vpop.eup %1573  ;;  %v927_v8 = vadd.f32 1.0, %v1572_v5 }
0x1189   :  { %v1186_v57 = vadd.f32 %v1868_v46, %v1185_v56  ;;  %v1442_v58 = vpop.f32.mrb[22].mxu0  ;;  %v928_v9 = vadd.f32 1.0, %v1574_v7 }
0x118a   :  { %1238 = vst.msk [vmem:[%s1981_s6 + $0x30] sm:$0xff] %vm95_vm0, %v1194_v55  ;;  %v1197_v3 = vadd.f32 %v1442_v58, %v1868_v46  ;;  %v1188_v59 = vpop.f32.mrb[23].mxu0  ;;  %1575 = vrcp.f32 %v927_v8 }
0x118b   :  { %1236 = vst.msk [vmem:[%s1981_s6 + $0x20] sm:$0xff] %vm95_vm0, %v1186_v57  ;;  %v1189_v4 = vadd.f32 %v1868_v46, %v1188_v59  ;;  %1577 = vrcp.f32 %v928_v9 }
0x118c   :  { %1239 = vst.msk [vmem:[%s1981_s6 + $0x38] sm:$0xff] %vm95_vm0, %v1197_v3 }
0x118d   :  { %1237 = vst.msk [vmem:[%s1981_s6 + $0x28] sm:$0xff] %vm95_vm0, %v1189_v4 }
0x118f   :  { %v1445_v6 = vpop.f32.mrb[24].mxu0 }
0x1190   :  { %v1210_v60 = vadd.f32 %v1445_v6, %v1868_v46  ;;  %v1201_v11 = vpop.f32.mrb[25].mxu0 }
0x1191   :  { %v1202_v61 = vadd.f32 %v1868_v46, %v1201_v11  ;;  %v1446_v13 = vpop.f32.mrb[26].mxu0 }
0x1192   :  { %1242 = vst.msk [vmem:[%s1981_s6 + $0x50] sm:$0xff] %vm95_vm0, %v1210_v60  ;;  %v1213_v62 = vadd.f32 %v1446_v13, %v1868_v46  ;;  %v1204_v63 = vpop.f32.mrb[27].mxu0 }
0x1193   :  { %1240 = vst.msk [vmem:[%s1981_s6 + $0x40] sm:$0xff] %vm95_vm0, %v1202_v61  ;;  %v1205_v0 = vadd.f32 %v1868_v46, %v1204_v63 }
0x1194   :  { %1243 = vst.msk [vmem:[%s1981_s6 + $0x58] sm:$0xff] %vm95_vm0, %v1213_v62  ;;  %v1576_v15 = vpop.eup %1575 }
0x1195   :  { %1241 = vst.msk [vmem:[%s1981_s6 + $0x48] sm:$0xff] %vm95_vm0, %v1205_v0  ;;  %v1578_v24 = vpop.eup %1577  ;;  %v935_v27 = vmul.f32 %v1576_v15, %v1838_v10 }
0x1196   :  { %v936_v12 = vmul.f32 %v1578_v24, %v1841_v17 }
0x11f7   :  { %v940_v16 = vpop.permute.xlu0 %939 }
0x11f8   :  { %v945_v18 = vmul.f32 %v1576_v15, %v940_v16 }
0x11f9   :  { %v942_v25 = vpop.permute.xlu1 %941 }
0x11fa   :  { %949 = vrot.lane.b32.xlu0 %v945_v18, %s1602_s15  ;;  %v946_v26 = vmul.f32 %v1578_v24, %v942_v25 }
0x11fc   :  { %951 = vrot.lane.b32.xlu1 %v946_v26, %s1602_s15 }
0x126c   :  { %v950_v28 = vpop.permute.xlu0 %949 }
0x126d   :  { %v955_v29 = vadd.f32 %v950_v28, %v935_v27 }
0x126e   :  { %v952_v30 = vpop.permute.xlu1 %951 }
0x126f   :  { %1579 = vtanh.f32 %v955_v29  ;;  %v956_v14 = vadd.f32 %v952_v30, %v936_v12 }
0x1271   :  { %1581 = vtanh.f32 %v956_v14 }
0x1279   :  { %v1580_v31 = vpop.eup %1579 }
0x127a   :  { %961 = vrot.lane.b32.xlu0 %v1580_v31, %s1602_s15 }
0x127b   :  { %v1582_v33 = vpop.eup %1581 }
0x127c   :  { %963 = vrot.lane.b32.xlu1 %v1582_v33, %s1602_s15 }
0x12ec   :  { %v962_v32 = vpop.permute.xlu0 %961 }
0x12ed   :  { %v967_v35 = vmul.f32 %v1576_v15, %v962_v32 }
0x12ee   :  { %v964_v34 = vpop.permute.xlu1 %963 }
0x12ef   :  { %v968_v36 = vmul.f32 %v1578_v24, %v964_v34 }
0x12f1   :  { %v969_v37 = vpack.c.bf16 %v968_v36, %v967_v35 }
0x12f3   :  { %971 = vrot.lane.b32.xlu0 %v969_v37, %s1603_s3 }
0x1365   :  { %v972_v10 = vpop.permute.xlu0 %971 }
0x1366   :  { %975 = vst.msk [vmem:[#allocation3 + $0x30] sm:$0xff] %vm251_vm2, %v972_v10  ;;  %1428 = vmatmul.mubr.msk.bf16.vlgmr.msra.gmra.mrb[28].mxu1 %vm251_vm2, %v972_v10 }
0x136d   :  { %v1086_v17 = vld [vmem:[#allocation3 + $0x30] sm:$0xff] }
0x136e   :  { %1447 = vmatprep.mubr.msk.bf16.mxu0 %vm251_vm2, %v1086_v17 }
0x1439   :  { %v1016_v39 = vpop.f32.mrb[28].mxu1 }
0x143a   :  { %v1023_v41 = vadd.f32 %v1016_v39, %v211_v38  ;;  %v1429_v42 = vpop.f32.mrb[29].mxu1 }
0x143b   :  { %v1019_v43 = vpop.f32.mrb[30].mxu1 }
0x143c   :  { %1583 = vtanh.f32 %v1023_v41  ;;  %v1024_v44 = vadd.f32 %v1019_v43, %v214_v40  ;;  %v1430_v45 = vpop.f32.mrb[31].mxu1  ;;  %v1293_v47 = vmul.f32 -1.442695, %v1023_v41 }
0x143e   :  { %1585 = vtanh.f32 %v1024_v44  ;;  %v1294_v49 = vmul.f32 -1.442695, %v1024_v44 }
0x143f   :  { %1587 = vpow2.f32 %v1293_v47 }
0x1440   :  { %1589 = vpow2.f32 %v1294_v49 }
0x1446   :  { %v1584_v48 = vpop.eup %1583 }
0x1447   :  { %1043 = vrot.lane.b32.xlu1 %v1584_v48, %s1602_s15 }
0x1448   :  { %v1586_v20 = vpop.eup %1585 }
0x1449   :  { %1045 = vrot.lane.b32.xlu0 %v1586_v20, %s1602_s15  ;;  %v1588_v19 = vpop.eup %1587 }
0x144a   :  { %v1590_v22 = vpop.eup %1589  ;;  %v1031_v21 = vadd.f32 1.0, %v1588_v19 }
0x144b   :  { %v1032_v23 = vadd.f32 1.0, %v1590_v22 }
0x144c   :  { %1591 = vrcp.f32 %v1031_v21 }
0x144d   :  { %1593 = vrcp.f32 %v1032_v23 }
0x1456   :  { %v1592_v50 = vpop.eup %1591 }
0x1457   :  { %v1594_v53 = vpop.eup %1593  ;;  %v1039_v56 = vmul.f32 %v1592_v50, %v955_v29 }
0x1458   :  { %v1040_v3 = vmul.f32 %v1594_v53, %v956_v14 }
0x14b9   :  { %v1044_v51 = vpop.permute.xlu1 %1043 }
0x14ba   :  { %v1049_v52 = vmul.f32 %v1592_v50, %v1044_v51 }
0x14bb   :  { %v1046_v54 = vpop.permute.xlu0 %1045 }
0x14bc   :  { %1053 = vrot.lane.b32.xlu1 %v1049_v52, %s1602_s15  ;;  %v1050_v55 = vmul.f32 %v1594_v53, %v1046_v54 }
0x14be   :  { %1055 = vrot.lane.b32.xlu0 %v1050_v55, %s1602_s15 }
0x152e   :  { %v1054_v57 = vpop.permute.xlu1 %1053 }
0x152f   :  { %v1059_v58 = vadd.f32 %v1054_v57, %v1039_v56 }
0x1530   :  { %v1056_v59 = vpop.permute.xlu0 %1055 }
0x1531   :  { %1595 = vtanh.f32 %v1059_v58  ;;  %v1060_v4 = vadd.f32 %v1056_v59, %v1040_v3 }
0x1533   :  { %1597 = vtanh.f32 %v1060_v4 }
0x153b   :  { %v1596_v6 = vpop.eup %1595 }
0x153c   :  { %1065 = vrot.lane.b32.xlu1 %v1596_v6, %s1602_s15 }
0x153d   :  { %v1598_v60 = vpop.eup %1597 }
0x153e   :  { %1067 = vrot.lane.b32.xlu0 %v1598_v60, %s1602_s15 }
0x15ae   :  { %v1066_v11 = vpop.permute.xlu1 %1065 }
0x15af   :  { %v1071_v13 = vmul.f32 %v1592_v50, %v1066_v11 }
0x15b0   :  { %v1068_v61 = vpop.permute.xlu0 %1067 }
0x15b1   :  { %v1072_v62 = vmul.f32 %v1594_v53, %v1068_v61 }
0x15b3   :  { %v1073_v63 = vpack.c.bf16 %v1072_v62, %v1071_v13 }
0x15b5   :  { %1075 = vrot.lane.b32.xlu1 %v1073_v63, %s1603_s3 }
0x1627   :  { %v1076_v0 = vpop.permute.xlu1 %1075 }
0x1628   :  { %1079 = vst.msk [vmem:[#allocation3 + $0x38] sm:$0xff] %vm251_vm2, %v1076_v0 }
0x162f   :  { %v1087_v1 = vld [vmem:[#allocation3 + $0x38] sm:$0xff] }
0x1630   :  { %1448 = vmatmul.mubr.msk.bf16.gmra.mrb[28].mxu0 %vm251_vm2, %v1087_v1 }
0x1703   :  { %v1449_v2 = vpop.f32.mrb[28].mxu0 }
0x1704   :  { %v1226_v5 = vadd.f32 %v1449_v2, %v1868_v46  ;;  %v1217_v7 = vpop.f32.mrb[29].mxu0 }
0x1705   :  { %v1218_v8 = vadd.f32 %v1868_v46, %v1217_v7  ;;  %v1450_v9 = vpop.f32.mrb[30].mxu0 }
0x1706   :  { %1246 = vst.msk [vmem:[%s1981_s6 + $0x70] sm:$0xff] %vm95_vm0, %v1226_v5  ;;  %v1229_v15 = vadd.f32 %v1450_v9, %v1868_v46  ;;  %v1220_v16 = vpop.f32.mrb[31].mxu0 }
0x1707   :  { %1244 = vst.msk [vmem:[%s1981_s6 + $0x60] sm:$0xff] %vm95_vm0, %v1218_v8  ;;  %v1221_v18 = vadd.f32 %v1868_v46, %v1220_v16 }
0x1708   :  { %1247 = vst.msk [vmem:[%s1981_s6 + $0x78] sm:$0xff] %vm95_vm0, %v1229_v15 }
0x1709   :  { %1245 = vst.msk [vmem:[%s1981_s6 + $0x68] sm:$0xff] %vm95_vm0, %v1221_v18 }

// kernel: tpu_custom_call.1
= control target key start
LH: loop header
LB: loop body
LE: loop exit
PB: predicated region body
PF: predicated region fallthrough
CT: control target
= control target key end

     0   :  { %vm95_vm0 = vcmask 130048   ;;  %v1599_v4 = vmov 0.0   ;;  %vm1600_vm1 = vmmov 0   ;;  %v1601_v10 = vmov 0   ;;  %s1602_s15 = smov 32   ;;  %s1975_s1 = inlined_call_operand.vmem [shape: bf16[16,128], index: 1, kind: input, shape index: {}]   ;;  %s1976_s0 = inlined_call_operand.vmem [shape: bf16[128,16], index: 0, kind: input, shape index: {}]   ;;  %s1977_s2 = inlined_call_operand.vmem [shape: bf16[32,128], index: 2, kind: input, shape index: {}]   ;;  %s1978_s3 = inlined_call_operand.vmem [shape: f32[1,128], index: 3, kind: input, shape index: {}]   ;;  %s1979_s4 = inlined_call_operand.vmem [shape: bf16[32,16], index: 4, kind: input, shape index: {}]   ;;  %s1980_s5 = inlined_call_operand.vmem [shape: f32[1,16], index: 5, kind: input, shape index: {}]   ;;  %s1981_s6 = inlined_call_operand.vmem [shape: f32[128,16], index: 6, kind: output, shape index: {}]  }
   0x1   :  { %v1458_v0 = vld [vmem:[%s1975_s1] sm:$0xff]   ;;  %v1460_v2 = vld [vmem:[%s1976_s0 + $0x28] sm:$0xff]   ;;  %v1462_v5 = vld [vmem:[%s1976_s0 + $0x30] sm:$0xff]   ;;  %vm251_vm2 = vcmask 261120  }
   0x2   :  { %v1459_v1 = vld [vmem:[%s1976_s0 + $0x20] sm:$0xff]   ;;  %1451 = vmatprep.subr.bf16.mxu1 %v1458_v0  ;;  %1349 = vmatprep.subr.bf16.mxu0 %v1458_v0  ;;  %v1663_v6 = vld [vmem:[%s1977_s2 + $0x8] sm:$0xff]   ;;  %v1463_v9 = vld [vmem:[%s1976_s0 + $0x38] sm:$0xff]  }
   0x3   :  { %1452 = vmatpush3.bf16.msra.mxu1 %v1458_v0  ;;  %1359 = vmatprep.mubr.msk.bf16.mxu1 %vm95_vm0, %v1459_v1  ;;  %v1652_v3 = vld [vmem:[%s1977_s2] sm:$0xff]   ;;  %v1466_v8 = vld [vmem:[%s1976_s0 + $0x8] sm:$0xff]  }
   0x4   :  { %1367 = vmatprep.subr.bf16.mxu1 %v1599_v4  ;;  %1350 = vmatpush3.bf16.msra.mxu0 %v1458_v0  ;;  %v1465_v7 = vld [vmem:[%s1976_s0] sm:$0xff]  }
   0x5   :  { %1399 = vmatprep.subr.bf16.mxu0 %v1599_v4  ;;  %1351 = vmatprep.mubr.msk.bf16.mxu0 %vm95_vm0, %v1465_v7  ;;  %v1717_v23 = vld [vmem:[%s1978_s3] ss:$0 sm:$0xff]  ;;  %s1603_s3 = smov 64  }
   0x6   :  { %1360 = vmatmul.mubr.msk.bf16.vlgmr.msra.gmra.mrb[0].mxu1 %vm95_vm0, %v1460_v2 }
   0x7   :  { %1368 = vmatpush3.bf16.msra.mxu1 %v1652_v3  ;;  %1363 = vmatprep.mubr.msk.bf16.mxu1 %vm95_vm0, %v1462_v5 }
   0x8   :  { %1369 = vmatprep.subr.bf16.mxu1 %v1599_v4  ;;  %1352 = vmatmul.mubr.msk.bf16.vlgmr.msra.gmra.mrb[0].mxu0 %vm95_vm0, %v1466_v8 }
   0x9   :  { %1400 = vmatpush3.bf16.msra.mxu0 %v1652_v3 }
   0xa   :  { %1401 = vmatprep.subr.bf16.mxu0 %v1599_v4 }
   0xb   :  { %1370 = vmatpush3.bf16.msra.mxu1 %v1663_v6 }
   0xc   :  { %1375 = vmatprep.subr.bf16.mxu1 %v1599_v4 }
   0xd   :  { %1402 = vmatpush3.bf16.msra.mxu0 %v1663_v6 }
   0xe   :  { %1364 = vmatmul.mubr.msk.bf16.gmra.mrb[4].mxu1 %vm95_vm0, %v1463_v9  ;;  %1415 = vmatprep.subr.bf16.mxu0 %v1599_v4 }
   0xf   :  { %1371 = vmatprep.mubr.msk.bf16.mxu1 %vm1600_vm1, %v1599_v4 }
  0x16   :  { %1372 = vmatmul.mubr.bf16.vlgmr.msra.gmra.mrb[8].mxu1 %v1601_v10 }
  0x17   :  { %1376 = vmatpush3.bf16.msra.mxu1 %v1652_v3  ;;  %1379 = vmatprep.mubr.msk.bf16.mxu1 %vm1600_vm1, %v1599_v4 }
  0x18   :  { %1377 = vmatprep.subr.bf16.mxu1 %v1599_v4 }
  0x1b   :  { %1378 = vmatpush3.bf16.msra.mxu1 %v1663_v6 }
  0x1c   :  { %1383 = vmatprep.subr.bf16.mxu1 %v1599_v4 }
  0xd9   :  { %v1694_v11 = vpop.f32.mrb[0].mxu1 }
  0xda   :  { %v1696_v12 = vpop.f32.mrb[1].mxu1 }
  0xdb   :  { %v1698_v13 = vpop.f32.mrb[2].mxu1  ;;  %v1702_v15 = vpop.f32.mrb[0].mxu0 }
  0xdc   :  { %v1700_v14 = vpop.f32.mrb[3].mxu1  ;;  %v154_v16 = vpop.f32.mrb[1].mxu0  ;;  %v163_v60 = vadd.f32 %v1702_v15, %v1717_v23 }
  0xdd   :  { %v1704_v17 = vpop.f32.mrb[2].mxu0  ;;  %v155_v24 = vadd.f32 %v1717_v23, %v154_v16 }
  0xde   :  { %v157_v18 = vpop.f32.mrb[3].mxu0  ;;  %v166_v62 = vadd.f32 %v1704_v17, %v1717_v23 }
  0xdf   :  { %v158_v26 = vadd.f32 %v1717_v23, %v157_v18 }
  0xe1   :  { %v1706_v19 = vpop.f32.mrb[4].mxu1 }
  0xe2   :  { %v1708_v20 = vpop.f32.mrb[5].mxu1 }
  0xe3   :  { %v1710_v21 = vpop.f32.mrb[6].mxu1 }
  0xe4   :  { %v1712_v22 = vpop.f32.mrb[7].mxu1 }
  0xe9   :  { %v289_v25 = vpop.f32.mrb[8].mxu1 }
  0xea   :  { %v296_v27 = vadd.f32 %v289_v25, %v155_v24  ;;  %v1373_v28 = vpop.f32.mrb[9].mxu1 }
  0xeb   :  { %v292_v29 = vpop.f32.mrb[10].mxu1 }
  0xec   :  { %1471 = vtanh.f32 %v296_v27  ;;  %v297_v30 = vadd.f32 %v292_v29, %v158_v26  ;;  %v1374_v31 = vpop.f32.mrb[11].mxu1  ;;  %v1272_v34 = vmul.f32 -1.442695, %v296_v27 }
  0xee   :  { %1473 = vtanh.f32 %v297_v30  ;;  %v1273_v35 = vmul.f32 -1.442695, %v297_v30 }
  0xef   :  { %1475 = vpow2.f32 %v1272_v34 }
  0xf0   :  { %1477 = vpow2.f32 %v1273_v35 }
  0xf6   :  { %v1472_v32 = vpop.eup %1471 }
  0xf7   :  { %316 = vrot.lane.b32.xlu0 %v1472_v32, %s1602_s15 }
  0xf8   :  { %v1474_v33 = vpop.eup %1473 }
  0xf9   :  { %v1476_v36 = vpop.eup %1475 }
  0xfa   :  { %v304_v37 = vadd.f32 1.0, %v1476_v36  ;;  %v1478_v38 = vpop.eup %1477  ;;  %v1467_v36 = vld [vmem:[%s1976_s0 + $0x10] sm:$0xff]  }
  0xfb   :  { %318 = vrot.lane.b32.xlu0 %v1474_v33, %s1602_s15  ;;  %v305_v39 = vadd.f32 1.0, %v1478_v38  ;;  %1355 = vmatprep.mubr.msk.bf16.mxu0 %vm95_vm0, %v1467_v36 }
  0xfc   :  { %1479 = vrcp.f32 %v304_v37  ;;  %v1468_v37 = vld [vmem:[%s1976_s0 + $0x18] sm:$0xff]  }
  0xfd   :  { %1481 = vrcp.f32 %v305_v39  ;;  %1356 = vmatmul.mubr.msk.bf16.gmra.mrb[4].mxu0 %vm95_vm0, %v1468_v37 }
  0xfe   :  { %1403 = vmatprep.mubr.msk.bf16.mxu0 %vm1600_vm1, %v1599_v4 }
 0x106   :  { %v1480_v40 = vpop.eup %1479 }
 0x107   :  { %v1482_v43 = vpop.eup %1481  ;;  %v312_v46 = vmul.f32 0.0, %v1480_v40 }
 0x108   :  { %v313_v49 = vmul.f32 0.0, %v1482_v43 }
 0x169   :  { %v317_v41 = vpop.permute.xlu0 %316 }
 0x16a   :  { %v322_v42 = vmul.f32 %v1480_v40, %v317_v41 }
 0x16c   :  { %326 = vrot.lane.b32.xlu1 %v322_v42, %s1602_s15 }
 0x16d   :  { %v319_v44 = vpop.permute.xlu0 %318 }
 0x16e   :  { %v323_v45 = vmul.f32 %v1482_v43, %v319_v44 }
 0x170   :  { %328 = vrot.lane.b32.xlu1 %v323_v45, %s1602_s15 }
 0x1d0   :  { %v1763_v45 = vpop.f32.mrb[4].mxu0 }
 0x1de   :  { %v327_v47 = vpop.permute.xlu1 %326 }
 0x1df   :  { %v332_v48 = vadd.f32 %v327_v47, %v312_v46  ;;  %v170_v46 = vpop.f32.mrb[5].mxu0 }
 0x1e0   :  { %v1765_v47 = vpop.f32.mrb[6].mxu0 }
 0x1e1   :  { %1483 = vtanh.f32 %v332_v48  ;;  %v182_v36 = vadd.f32 %v1765_v47, %v1717_v23 }
 0x1e2   :  { %v329_v50 = vpop.permute.xlu1 %328 }
 0x1e3   :  { %v333_v51 = vadd.f32 %v329_v50, %v313_v49  ;;  %v171_v50 = vadd.f32 %v1717_v23, %v170_v46 }
 0x1e5   :  { %1485 = vtanh.f32 %v333_v51 }
 0x1eb   :  { %v1484_v52 = vpop.eup %1483 }
 0x1ec   :  { %338 = vrot.lane.b32.xlu0 %v1484_v52, %s1602_s15 }
 0x1ef   :  { %v1486_v53 = vpop.eup %1485 }
 0x1f0   :  { %340 = vrot.lane.b32.xlu1 %v1486_v53, %s1602_s15 }
 0x25e   :  { %v339_v54 = vpop.permute.xlu0 %338 }
 0x25f   :  { %v344_v56 = vmul.f32 %v1480_v40, %v339_v54 }
 0x262   :  { %v341_v55 = vpop.permute.xlu1 %340 }
 0x263   :  { %v345_v57 = vmul.f32 %v1482_v43, %v341_v55 }
 0x265   :  { %v346_v58 = vpack.c.bf16 %v345_v57, %v344_v56 }
 0x267   :  { %348 = vrot.lane.b32.xlu0 %v346_v58, %s1603_s3 }
 0x2d9   :  { %v349_v59 = vpop.permute.xlu0 %348 }
 0x2da   :  { %351 = vst.msk [vmem:[#allocation3] sm:$0xff] %vm251_vm2, %v349_v59  ;;  %1380 = vmatmul.mubr.msk.bf16.vlgmr.msra.gmra.mrb[12].mxu1 %vm251_vm2, %v349_v59 }
 0x2db   :  { %1384 = vmatpush3.bf16.msra.mxu1 %v1652_v3  ;;  %1387 = vmatprep.mubr.msk.bf16.mxu1 %vm1600_vm1, %v1599_v4 }
 0x2dc   :  { %1385 = vmatprep.subr.bf16.mxu1 %v1599_v4 }
 0x2df   :  { %1386 = vmatpush3.bf16.msra.mxu1 %v1663_v6 }
 0x2e0   :  { %1391 = vmatprep.subr.bf16.mxu1 %v1599_v4 }
 0x3ad   :  { %v392_v61 = vpop.f32.mrb[12].mxu1 }
 0x3ae   :  { %v399_v63 = vadd.f32 %v392_v61, %v163_v60  ;;  %v1381_v0 = vpop.f32.mrb[13].mxu1 }
 0x3af   :  { %v395_v1 = vpop.f32.mrb[14].mxu1 }
 0x3b0   :  { %1487 = vtanh.f32 %v399_v63  ;;  %v400_v2 = vadd.f32 %v395_v1, %v166_v62  ;;  %v1382_v5 = vpop.f32.mrb[15].mxu1  ;;  %v1275_v9 = vmul.f32 -1.442695, %v399_v63 }
 0x3b2   :  { %1489 = vtanh.f32 %v400_v2  ;;  %v1276_v10 = vmul.f32 -1.442695, %v400_v2 }
 0x3b3   :  { %1491 = vpow2.f32 %v1275_v9 }
 0x3b4   :  { %1493 = vpow2.f32 %v1276_v10 }
 0x3ba   :  { %v1488_v7 = vpop.eup %1487 }
 0x3bb   :  { %419 = vrot.lane.b32.xlu1 %v1488_v7, %s1602_s15 }
 0x3bc   :  { %v1490_v8 = vpop.eup %1489 }
 0x3bd   :  { %421 = vrot.lane.b32.xlu0 %v1490_v8, %s1602_s15  ;;  %v1492_v15 = vpop.eup %1491 }
 0x3be   :  { %v1494_v16 = vpop.eup %1493  ;;  %v407_v17 = vadd.f32 1.0, %v1492_v15 }
 0x3bf   :  { %v408_v18 = vadd.f32 1.0, %v1494_v16 }
 0x3c0   :  { %1495 = vrcp.f32 %v407_v17 }
 0x3c1   :  { %1497 = vrcp.f32 %v408_v18 }
 0x3ca   :  { %v1496_v24 = vpop.eup %1495 }
 0x3cb   :  { %v1498_v27 = vpop.eup %1497  ;;  %v415_v30 = vmul.f32 %v1496_v24, %v332_v48  ;;  %v173_v48 = vpop.f32.mrb[7].mxu0 }
 0x3cc   :  { %v416_v33 = vmul.f32 %v1498_v27, %v333_v51  ;;  %v174_v52 = vadd.f32 %v1717_v23, %v173_v48 }
 0x42d   :  { %v420_v25 = vpop.permute.xlu1 %419 }
 0x42e   :  { %v425_v26 = vmul.f32 %v1496_v24, %v420_v25 }
 0x42f   :  { %v422_v28 = vpop.permute.xlu0 %421 }
 0x430   :  { %429 = vrot.lane.b32.xlu1 %v425_v26, %s1602_s15  ;;  %v426_v29 = vmul.f32 %v1498_v27, %v422_v28 }
 0x432   :  { %431 = vrot.lane.b32.xlu0 %v426_v29, %s1602_s15 }
 0x4a2   :  { %v430_v31 = vpop.permute.xlu1 %429 }
 0x4a3   :  { %v1744_v32 = vadd.f32 %v430_v31, %v415_v30 }
 0x4a4   :  { %v432_v34 = vpop.permute.xlu0 %431 }
 0x4a5   :  { %1499 = vtanh.f32 %v1744_v32  ;;  %v1747_v35 = vadd.f32 %v432_v34, %v416_v33  ;;  %v179_v34 = vadd.f32 %v1763_v45, %v1717_v23 }
 0x4a7   :  { %1501 = vtanh.f32 %v1747_v35 }
 0x4af   :  { %v1500_v38 = vpop.eup %1499 }
 0x4b0   :  { %441 = vrot.lane.b32.xlu1 %v1500_v38, %s1602_s15 }
 0x4b1   :  { %v1502_v39 = vpop.eup %1501 }
 0x4b2   :  { %443 = vrot.lane.b32.xlu0 %v1502_v39, %s1602_s15 }
 0x522   :  { %v442_v40 = vpop.permute.xlu1 %441 }
 0x523   :  { %v447_v42 = vmul.f32 %v1496_v24, %v442_v40 }
 0x524   :  { %v444_v41 = vpop.permute.xlu0 %443 }
 0x525   :  { %v448_v43 = vmul.f32 %v1498_v27, %v444_v41 }
 0x527   :  { %v449_v44 = vpack.c.bf16 %v448_v43, %v447_v42 }
 0x529   :  { %451 = vrot.lane.b32.xlu1 %v449_v44, %s1603_s3 }
 0x59b   :  { %v452_v49 = vpop.permute.xlu1 %451 }
 0x59c   :  { %455 = vst.msk [vmem:[#allocation3 + $0x8] sm:$0xff] %vm251_vm2, %v452_v49  ;;  %1388 = vmatmul.mubr.msk.bf16.vlgmr.msra.gmra.mrb[16].mxu1 %vm251_vm2, %v452_v49 }
 0x59d   :  { %1392 = vmatpush3.bf16.msra.mxu1 %v1652_v3  ;;  %1395 = vmatprep.mubr.msk.bf16.mxu1 %vm1600_vm1, %v1599_v4 }
 0x59e   :  { %1393 = vmatprep.subr.bf16.mxu1 %v1599_v4 }
 0x5a1   :  { %1394 = vmatpush3.bf16.msra.mxu1 %v1663_v6 }
 0x5a2   :  { %1407 = vmatprep.subr.bf16.mxu1 %v1599_v4 }
 0x66f   :  { %v496_v51 = vpop.f32.mrb[16].mxu1 }
 0x670   :  { %v503_v53 = vadd.f32 %v496_v51, %v171_v50  ;;  %v1389_v54 = vpop.f32.mrb[17].mxu1 }
 0x671   :  { %v499_v55 = vpop.f32.mrb[18].mxu1 }
 0x672   :  { %1503 = vtanh.f32 %v503_v53  ;;  %v504_v56 = vadd.f32 %v499_v55, %v174_v52  ;;  %v1390_v57 = vpop.f32.mrb[19].mxu1  ;;  %v1278_v60 = vmul.f32 -1.442695, %v503_v53 }
 0x674   :  { %1505 = vtanh.f32 %v504_v56  ;;  %v1279_v61 = vmul.f32 -1.442695, %v504_v56 }
 0x675   :  { %1507 = vpow2.f32 %v1278_v60 }
 0x676   :  { %1509 = vpow2.f32 %v1279_v61 }
 0x67c   :  { %v1504_v58 = vpop.eup %1503 }
 0x67d   :  { %523 = vrot.lane.b32.xlu0 %v1504_v58, %s1602_s15 }
 0x67e   :  { %v1506_v59 = vpop.eup %1505 }
 0x67f   :  { %525 = vrot.lane.b32.xlu1 %v1506_v59, %s1602_s15  ;;  %v1508_v62 = vpop.eup %1507 }
 0x680   :  { %v1510_v63 = vpop.eup %1509  ;;  %v511_v0 = vadd.f32 1.0, %v1508_v62 }
 0x681   :  { %v512_v1 = vadd.f32 1.0, %v1510_v63 }
 0x682   :  { %1511 = vrcp.f32 %v511_v0 }
 0x683   :  { %1513 = vrcp.f32 %v512_v1 }
 0x68c   :  { %v1512_v2 = vpop.eup %1511 }
 0x68d   :  { %v1514_v8 = vpop.eup %1513  ;;  %v519_v15 = vmul.f32 %v1512_v2, %v1744_v32 }
 0x68e   :  { %v520_v18 = vmul.f32 %v1514_v8, %v1747_v35 }
 0x6ef   :  { %v524_v5 = vpop.permute.xlu0 %523 }
 0x6f0   :  { %v529_v7 = vmul.f32 %v1512_v2, %v524_v5 }
 0x6f1   :  { %v526_v9 = vpop.permute.xlu1 %525 }
 0x6f2   :  { %533 = vrot.lane.b32.xlu0 %v529_v7, %s1602_s15  ;;  %v530_v10 = vmul.f32 %v1514_v8, %v526_v9  ;;  %v187_v9 = vadd.f32 %v1717_v23, %v1696_v12 }
 0x6f4   :  { %535 = vrot.lane.b32.xlu1 %v530_v10, %s1602_s15 }
 0x764   :  { %v534_v16 = vpop.permute.xlu0 %533 }
 0x765   :  { %v539_v17 = vadd.f32 %v534_v16, %v519_v15  ;;  %v190_v15 = vadd.f32 %v1717_v23, %v1700_v14 }
 0x766   :  { %v536_v24 = vpop.permute.xlu1 %535 }
 0x767   :  { %1515 = vtanh.f32 %v539_v17  ;;  %v540_v25 = vadd.f32 %v536_v24, %v520_v18 }
 0x769   :  { %1517 = vtanh.f32 %v540_v25 }
 0x771   :  { %v1516_v26 = vpop.eup %1515 }
 0x772   :  { %545 = vrot.lane.b32.xlu0 %v1516_v26, %s1602_s15 }
 0x773   :  { %v1518_v27 = vpop.eup %1517 }
 0x774   :  { %547 = vrot.lane.b32.xlu1 %v1518_v27, %s1602_s15 }
 0x7e4   :  { %v546_v28 = vpop.permute.xlu0 %545 }
 0x7e5   :  { %v551_v30 = vmul.f32 %v1512_v2, %v546_v28 }
 0x7e6   :  { %v548_v29 = vpop.permute.xlu1 %547 }
 0x7e7   :  { %v552_v31 = vmul.f32 %v1514_v8, %v548_v29 }
 0x7e9   :  { %v553_v33 = vpack.c.bf16 %v552_v31, %v551_v30 }
 0x7eb   :  { %555 = vrot.lane.b32.xlu0 %v553_v33, %s1603_s3 }
 0x85d   :  { %v556_v32 = vpop.permute.xlu0 %555 }
 0x85e   :  { %559 = vst.msk [vmem:[#allocation3 + $0x10] sm:$0xff] %vm251_vm2, %v556_v32  ;;  %1396 = vmatmul.mubr.msk.bf16.vlgmr.msra.gmra.mrb[20].mxu1 %vm251_vm2, %v556_v32 }
 0x85f   :  { %1408 = vmatpush3.bf16.msra.mxu1 %v1652_v3  ;;  %1411 = vmatprep.mubr.msk.bf16.mxu1 %vm1600_vm1, %v1599_v4 }
 0x860   :  { %1409 = vmatprep.subr.bf16.mxu1 %v1599_v4 }
 0x863   :  { %1410 = vmatpush3.bf16.msra.mxu1 %v1663_v6 }
 0x864   :  { %1423 = vmatprep.subr.bf16.mxu1 %v1599_v4 }
 0x931   :  { %v600_v35 = vpop.f32.mrb[20].mxu1 }
 0x932   :  { %v607_v37 = vadd.f32 %v600_v35, %v179_v34  ;;  %v1397_v38 = vpop.f32.mrb[21].mxu1 }
 0x933   :  { %v603_v39 = vpop.f32.mrb[22].mxu1 }
 0x934   :  { %1519 = vtanh.f32 %v607_v37  ;;  %v608_v40 = vadd.f32 %v603_v39, %v182_v36  ;;  %v1398_v41 = vpop.f32.mrb[23].mxu1  ;;  %v1281_v44 = vmul.f32 -1.442695, %v607_v37 }
 0x936   :  { %1521 = vtanh.f32 %v608_v40  ;;  %v1282_v46 = vmul.f32 -1.442695, %v608_v40 }
 0x937   :  { %1523 = vpow2.f32 %v1281_v44 }
 0x938   :  { %1525 = vpow2.f32 %v1282_v46 }
 0x93e   :  { %v1520_v42 = vpop.eup %1519 }
 0x93f   :  { %627 = vrot.lane.b32.xlu1 %v1520_v42, %s1602_s15 }
 0x940   :  { %v1522_v43 = vpop.eup %1521 }
 0x941   :  { %629 = vrot.lane.b32.xlu0 %v1522_v43, %s1602_s15  ;;  %v1524_v45 = vpop.eup %1523 }
 0x942   :  { %v1526_v48 = vpop.eup %1525  ;;  %v615_v47 = vadd.f32 1.0, %v1524_v45 }
 0x943   :  { %v616_v49 = vadd.f32 1.0, %v1526_v48 }
 0x944   :  { %1527 = vrcp.f32 %v615_v47 }
 0x945   :  { %1529 = vrcp.f32 %v616_v49 }
 0x94e   :  { %v1528_v50 = vpop.eup %1527 }
 0x94f   :  { %v1530_v53 = vpop.eup %1529  ;;  %v623_v56 = vmul.f32 %v1528_v50, %v539_v17 }
 0x950   :  { %v624_v59 = vmul.f32 %v1530_v53, %v540_v25 }
 0x9b1   :  { %v628_v51 = vpop.permute.xlu1 %627 }
 0x9b2   :  { %v633_v52 = vmul.f32 %v1528_v50, %v628_v51 }
 0x9b3   :  { %v630_v54 = vpop.permute.xlu0 %629 }
 0x9b4   :  { %637 = vrot.lane.b32.xlu1 %v633_v52, %s1602_s15  ;;  %v634_v55 = vmul.f32 %v1530_v53, %v630_v54  ;;  %v195_v52 = vadd.f32 %v1694_v11, %v1717_v23  ;;  %v198_v54 = vadd.f32 %v1698_v13, %v1717_v23 }
 0x9b6   :  { %639 = vrot.lane.b32.xlu0 %v634_v55, %s1602_s15 }
 0xa26   :  { %v638_v57 = vpop.permute.xlu1 %637 }
 0xa27   :  { %v643_v58 = vadd.f32 %v638_v57, %v623_v56 }
 0xa28   :  { %v640_v60 = vpop.permute.xlu0 %639 }
 0xa29   :  { %1531 = vtanh.f32 %v643_v58  ;;  %v644_v61 = vadd.f32 %v640_v60, %v624_v59 }
 0xa2b   :  { %1533 = vtanh.f32 %v644_v61 }
 0xa33   :  { %v1532_v62 = vpop.eup %1531 }
 0xa34   :  { %649 = vrot.lane.b32.xlu1 %v1532_v62, %s1602_s15 }
 0xa35   :  { %v1534_v63 = vpop.eup %1533 }
 0xa36   :  { %651 = vrot.lane.b32.xlu0 %v1534_v63, %s1602_s15 }
 0xaa6   :  { %v650_v0 = vpop.permute.xlu1 %649 }
 0xaa7   :  { %v655_v2 = vmul.f32 %v1528_v50, %v650_v0 }
 0xaa8   :  { %v652_v1 = vpop.permute.xlu0 %651 }
 0xaa9   :  { %v656_v5 = vmul.f32 %v1530_v53, %v652_v1 }
 0xaab   :  { %v657_v7 = vpack.c.bf16 %v656_v5, %v655_v2 }
 0xaad   :  { %659 = vrot.lane.b32.xlu1 %v657_v7, %s1603_s3 }
 0xb1f   :  { %v660_v8 = vpop.permute.xlu1 %659 }
 0xb20   :  { %663 = vst.msk [vmem:[#allocation3 + $0x18] sm:$0xff] %vm251_vm2, %v660_v8  ;;  %1404 = vmatmul.mubr.msk.bf16.vlgmr.msra.gmra.mrb[8].mxu0 %vm251_vm2, %v660_v8 }
 0xb21   :  { %1416 = vmatpush3.bf16.msra.mxu0 %v1652_v3  ;;  %1419 = vmatprep.mubr.msk.bf16.mxu0 %vm1600_vm1, %v1599_v4 }
 0xb22   :  { %1417 = vmatprep.subr.bf16.mxu0 %v1599_v4 }
 0xb25   :  { %1418 = vmatpush3.bf16.msra.mxu0 %v1663_v6 }
 0xbf3   :  { %v704_v10 = vpop.f32.mrb[8].mxu0 }
 0xbf4   :  { %v711_v16 = vadd.f32 %v704_v10, %v187_v9  ;;  %v1405_v17 = vpop.f32.mrb[9].mxu0 }
 0xbf5   :  { %v707_v18 = vpop.f32.mrb[10].mxu0 }
 0xbf6   :  { %1535 = vtanh.f32 %v711_v16  ;;  %v712_v24 = vadd.f32 %v707_v18, %v190_v15  ;;  %v1406_v25 = vpop.f32.mrb[11].mxu0  ;;  %v1284_v28 = vmul.f32 -1.442695, %v711_v16 }
 0xbf7   :  { %v1469_v25 = vld [vmem:[%s1979_s4] sm:$0xff]  }
 0xbf8   :  { %1537 = vtanh.f32 %v712_v24  ;;  %v1285_v29 = vmul.f32 -1.442695, %v712_v24  ;;  %1431 = vmatprep.subr.bf16.mxu0 %v1469_v25 }
 0xbf9   :  { %1539 = vpow2.f32 %v1284_v28 }
 0xbfa   :  { %1541 = vpow2.f32 %v1285_v29 }
 0xc00   :  { %v1536_v26 = vpop.eup %1535 }
 0xc01   :  { %731 = vrot.lane.b32.xlu0 %v1536_v26, %s1602_s15 }
 0xc02   :  { %v1538_v27 = vpop.eup %1537 }
 0xc03   :  { %733 = vrot.lane.b32.xlu1 %v1538_v27, %s1602_s15  ;;  %v1540_v12 = vpop.eup %1539 }
 0xc04   :  { %v1542_v30 = vpop.eup %1541  ;;  %v719_v14 = vadd.f32 1.0, %v1540_v12 }
 0xc05   :  { %v720_v31 = vadd.f32 1.0, %v1542_v30  ;;  %v1470_v30 = vld [vmem:[%s1979_s4 + $0x8] sm:$0xff]  }
 0xc06   :  { %1543 = vrcp.f32 %v719_v14 }
 0xc07   :  { %1545 = vrcp.f32 %v720_v31  ;;  %v1080_v31 = vld [vmem:[#allocation3] sm:$0xff] }
 0xc10   :  { %v1544_v33 = vpop.eup %1543 }
 0xc11   :  { %v1546_v35 = vpop.eup %1545  ;;  %v727_v38 = vmul.f32 %v1544_v33, %v643_v58 }
 0xc12   :  { %v728_v41 = vmul.f32 %v1546_v35, %v644_v61 }
 0xc73   :  { %v732_v32 = vpop.permute.xlu0 %731 }
 0xc74   :  { %v737_v34 = vmul.f32 %v1544_v33, %v732_v32  ;;  %v1082_v32 = vld [vmem:[#allocation3 + $0x10] sm:$0xff] }
 0xc75   :  { %v734_v36 = vpop.permute.xlu1 %733 }
 0xc76   :  { %741 = vrot.lane.b32.xlu0 %v737_v34, %s1602_s15  ;;  %v738_v37 = vmul.f32 %v1546_v35, %v734_v36  ;;  %v1083_v34 = vld [vmem:[#allocation3 + $0x18] sm:$0xff] }
 0xc78   :  { %743 = vrot.lane.b32.xlu1 %v738_v37, %s1602_s15  ;;  %v203_v37 = vadd.f32 %v1717_v23, %v1708_v20 }
 0xce8   :  { %v742_v39 = vpop.permute.xlu0 %741 }
 0xce9   :  { %v747_v40 = vadd.f32 %v742_v39, %v727_v38  ;;  %v206_v39 = vadd.f32 %v1717_v23, %v1712_v22 }
 0xcea   :  { %v744_v42 = vpop.permute.xlu1 %743 }
 0xceb   :  { %1547 = vtanh.f32 %v747_v40  ;;  %v748_v43 = vadd.f32 %v744_v42, %v728_v41 }
 0xced   :  { %1549 = vtanh.f32 %v748_v43 }
 0xcf5   :  { %v1548_v44 = vpop.eup %1547 }
 0xcf6   :  { %753 = vrot.lane.b32.xlu0 %v1548_v44, %s1602_s15 }
 0xcf7   :  { %v1550_v46 = vpop.eup %1549 }
 0xcf8   :  { %755 = vrot.lane.b32.xlu1 %v1550_v46, %s1602_s15  ;;  %v1868_v46 = vld [vmem:[%s1980_s5] ss:$0 sm:$0xff] }
 0xd68   :  { %v754_v45 = vpop.permute.xlu0 %753 }
 0xd69   :  { %v759_v47 = vmul.f32 %v1544_v33, %v754_v45  ;;  %v1081_v33 = vld [vmem:[#allocation3 + $0x8] sm:$0xff] }
 0xd6a   :  { %v756_v48 = vpop.permute.xlu1 %755 }
 0xd6b   :  { %v760_v49 = vmul.f32 %v1546_v35, %v756_v48 }
 0xd6d   :  { %v761_v50 = vpack.c.bf16 %v760_v49, %v759_v47 }
 0xd6f   :  { %763 = vrot.lane.b32.xlu0 %v761_v50, %s1603_s3 }
 0xde1   :  { %v764_v51 = vpop.permute.xlu0 %763 }
 0xde2   :  { %767 = vst.msk [vmem:[#allocation3 + $0x20] sm:$0xff] %vm251_vm2, %v764_v51  ;;  %1412 = vmatmul.mubr.msk.bf16.vlgmr.msra.gmra.mrb[24].mxu1 %vm251_vm2, %v764_v51 }
 0xde3   :  { %1424 = vmatpush3.bf16.msra.mxu1 %v1652_v3  ;;  %1427 = vmatprep.mubr.msk.bf16.mxu1 %vm1600_vm1, %v1599_v4 }
 0xde4   :  { %1425 = vmatprep.subr.bf16.mxu1 %v1599_v4 }
 0xde7   :  { %1426 = vmatpush3.bf16.msra.mxu1 %v1663_v6 }
 0xde9   :  { %v1084_v35 = vld [vmem:[#allocation3 + $0x20] sm:$0xff] }
 0xeb5   :  { %v808_v53 = vpop.f32.mrb[24].mxu1 }
 0xeb6   :  { %v815_v55 = vadd.f32 %v808_v53, %v195_v52  ;;  %v1413_v56 = vpop.f32.mrb[25].mxu1 }
 0xeb7   :  { %v811_v57 = vpop.f32.mrb[26].mxu1 }
 0xeb8   :  { %1551 = vtanh.f32 %v815_v55  ;;  %v816_v58 = vadd.f32 %v811_v57, %v198_v54  ;;  %v1414_v3 = vpop.f32.mrb[27].mxu1  ;;  %v1287_v6 = vmul.f32 -1.442695, %v815_v55 }
 0xeba   :  { %1553 = vtanh.f32 %v816_v58  ;;  %v1288_v60 = vmul.f32 -1.442695, %v816_v58 }
 0xebb   :  { %1555 = vpow2.f32 %v1287_v6 }
 0xebc   :  { %1557 = vpow2.f32 %v1288_v60 }
 0xec2   :  { %v1552_v59 = vpop.eup %1551 }
 0xec3   :  { %835 = vrot.lane.b32.xlu1 %v1552_v59, %s1602_s15 }
 0xec4   :  { %v1554_v4 = vpop.eup %1553 }
 0xec5   :  { %837 = vrot.lane.b32.xlu0 %v1554_v4, %s1602_s15  ;;  %v1556_v11 = vpop.eup %1555 }
 0xec6   :  { %v1558_v61 = vpop.eup %1557  ;;  %v823_v13 = vadd.f32 1.0, %v1556_v11 }
 0xec7   :  { %v824_v62 = vadd.f32 1.0, %v1558_v61 }
 0xec8   :  { %1559 = vrcp.f32 %v823_v13 }
 0xec9   :  { %1561 = vrcp.f32 %v824_v62 }
 0xed2   :  { %v1560_v63 = vpop.eup %1559 }
 0xed3   :  { %v1562_v2 = vpop.eup %1561  ;;  %v831_v8 = vmul.f32 %v1560_v63, %v747_v40 }
 0xed4   :  { %v832_v15 = vmul.f32 %v1562_v2, %v748_v43 }
 0xf35   :  { %v836_v0 = vpop.permute.xlu1 %835 }
 0xf36   :  { %v841_v1 = vmul.f32 %v1560_v63, %v836_v0 }
 0xf37   :  { %v838_v5 = vpop.permute.xlu0 %837 }
 0xf38   :  { %845 = vrot.lane.b32.xlu1 %v841_v1, %s1602_s15  ;;  %v842_v7 = vmul.f32 %v1562_v2, %v838_v5 }
 0xf3a   :  { %847 = vrot.lane.b32.xlu0 %v842_v7, %s1602_s15 }
 0xfaa   :  { %v846_v9 = vpop.permute.xlu1 %845 }
 0xfab   :  { %v1838_v10 = vadd.f32 %v846_v9, %v831_v8 }
 0xfac   :  { %v848_v16 = vpop.permute.xlu0 %847 }
 0xfad   :  { %1563 = vtanh.f32 %v1838_v10  ;;  %v1841_v17 = vadd.f32 %v848_v16, %v832_v15 }
 0xfaf   :  { %1565 = vtanh.f32 %v1841_v17 }
 0xfb7   :  { %v1564_v18 = vpop.eup %1563 }
 0xfb8   :  { %857 = vrot.lane.b32.xlu1 %v1564_v18, %s1602_s15 }
 0xfb9   :  { %v1566_v24 = vpop.eup %1565 }
 0xfba   :  { %859 = vrot.lane.b32.xlu0 %v1566_v24, %s1602_s15 }
0x102a   :  { %v858_v26 = vpop.permute.xlu1 %857 }
0x102b   :  { %v863_v28 = vmul.f32 %v1560_v63, %v858_v26 }
0x102c   :  { %v860_v27 = vpop.permute.xlu0 %859 }
0x102d   :  { %v864_v29 = vmul.f32 %v1562_v2, %v860_v27 }
0x102f   :  { %v865_v12 = vpack.c.bf16 %v864_v29, %v863_v28 }
0x1031   :  { %867 = vrot.lane.b32.xlu1 %v865_v12, %s1603_s3 }
0x10a3   :  { %v868_v14 = vpop.permute.xlu1 %867 }
0x10a4   :  { %871 = vst.msk [vmem:[#allocation3 + $0x28] sm:$0xff] %vm251_vm2, %v868_v14  ;;  %1420 = vmatmul.mubr.msk.bf16.vlgmr.msra.gmra.mrb[12].mxu0 %vm251_vm2, %v868_v14 }
0x10a5   :  { %1432 = vmatpush3.bf16.msra.mxu0 %v1469_v25  ;;  %1435 = vmatprep.mubr.msk.bf16.mxu0 %vm251_vm2, %v1080_v31 }
0x10a6   :  { %1433 = vmatprep.subr.bf16.mxu0 %v1470_v30 }
0x10a9   :  { %1434 = vmatpush3.bf16.msra.mxu0 %v1470_v30 }
0x10ab   :  { %v1085_v36 = vld [vmem:[#allocation3 + $0x28] sm:$0xff] }
0x10ac   :  { %1436 = vmatmul.mubr.msk.bf16.vlgmr.msra.gmra.mrb[16].mxu0 %vm251_vm2, %v1081_v33 }
0x10ad   :  { %1439 = vmatprep.mubr.msk.bf16.mxu0 %vm251_vm2, %v1082_v32 }
0x10b4   :  { %1440 = vmatmul.mubr.msk.bf16.gmra.mrb[20].mxu0 %vm251_vm2, %v1083_v34 }
0x10b5   :  { %1443 = vmatprep.mubr.msk.bf16.mxu0 %vm251_vm2, %v1084_v35 }
0x10bc   :  { %1444 = vmatmul.mubr.msk.bf16.gmra.mrb[24].mxu0 %vm251_vm2, %v1085_v36 }
0x1177   :  { %v912_v38 = vpop.f32.mrb[12].mxu0 }
0x1178   :  { %v919_v40 = vadd.f32 %v912_v38, %v203_v37  ;;  %v1421_v41 = vpop.f32.mrb[13].mxu0  ;;  %v211_v38 = vadd.f32 %v1706_v19, %v1717_v23 }
0x1179   :  { %v915_v42 = vpop.f32.mrb[14].mxu0 }
0x117a   :  { %1567 = vtanh.f32 %v919_v40  ;;  %v920_v43 = vadd.f32 %v915_v42, %v206_v39  ;;  %v1422_v44 = vpop.f32.mrb[15].mxu0  ;;  %v1290_v1 = vmul.f32 -1.442695, %v919_v40  ;;  %v214_v40 = vadd.f32 %v1710_v21, %v1717_v23 }
0x117c   :  { %1569 = vtanh.f32 %v920_v43  ;;  %v1291_v2 = vmul.f32 -1.442695, %v920_v43 }
0x117d   :  { %1571 = vpow2.f32 %v1290_v1 }
0x117e   :  { %1573 = vpow2.f32 %v1291_v2 }
0x117f   :  { %v1437_v45 = vpop.f32.mrb[16].mxu0 }
0x1180   :  { %v1178_v48 = vadd.f32 %v1437_v45, %v1868_v46  ;;  %v1169_v20 = vpop.f32.mrb[17].mxu0 }
0x1181   :  { %v1170_v47 = vadd.f32 %v1868_v46, %v1169_v20  ;;  %v1438_v49 = vpop.f32.mrb[18].mxu0 }
0x1182   :  { %1234 = vst.msk [vmem:[%s1981_s6 + $0x10] sm:$0xff] %vm95_vm0, %v1178_v48  ;;  %v1181_v22 = vadd.f32 %v1438_v49, %v1868_v46  ;;  %v1172_v50 = vpop.f32.mrb[19].mxu0 }
0x1183   :  { %1232 = vst.msk [vmem:[%s1981_s6] sm:$0xff] %vm95_vm0, %v1170_v47  ;;  %v1173_v51 = vadd.f32 %v1868_v46, %v1172_v50 }
0x1184   :  { %v1568_v52 = vpop.eup %1567  ;;  %1235 = vst.msk [vmem:[%s1981_s6 + $0x18] sm:$0xff] %vm95_vm0, %v1181_v22 }
0x1185   :  { %1233 = vst.msk [vmem:[%s1981_s6 + $0x8] sm:$0xff] %vm95_vm0, %v1173_v51  ;;  %939 = vrot.lane.b32.xlu0 %v1568_v52, %s1602_s15 }
0x1186   :  { %v1570_v53 = vpop.eup %1569 }
0x1187   :  { %v1441_v54 = vpop.f32.mrb[20].mxu0  ;;  %941 = vrot.lane.b32.xlu1 %v1570_v53, %s1602_s15  ;;  %v1572_v5 = vpop.eup %1571 }
0x1188   :  { %v1194_v55 = vadd.f32 %v1441_v54, %v1868_v46  ;;  %v1185_v56 = vpop.f32.mrb[21].mxu0  ;;  %v1574_v7 = vpop.eup %1573  ;;  %v927_v8 = vadd.f32 1.0, %v1572_v5 }
0x1189   :  { %v1186_v57 = vadd.f32 %v1868_v46, %v1185_v56  ;;  %v1442_v58 = vpop.f32.mrb[22].mxu0  ;;  %v928_v9 = vadd.f32 1.0, %v1574_v7 }
0x118a   :  { %1238 = vst.msk [vmem:[%s1981_s6 + $0x30] sm:$0xff] %vm95_vm0, %v1194_v55  ;;  %v1197_v3 = vadd.f32 %v1442_v58, %v1868_v46  ;;  %v1188_v59 = vpop.f32.mrb[23].mxu0  ;;  %1575 = vrcp.f32 %v927_v8 }
0x118b   :  { %1236 = vst.msk [vmem:[%s1981_s6 + $0x20] sm:$0xff] %vm95_vm0, %v1186_v57  ;;  %v1189_v4 = vadd.f32 %v1868_v46, %v1188_v59  ;;  %1577 = vrcp.f32 %v928_v9 }
0x118c   :  { %1239 = vst.msk [vmem:[%s1981_s6 + $0x38] sm:$0xff] %vm95_vm0, %v1197_v3 }
0x118d   :  { %1237 = vst.msk [vmem:[%s1981_s6 + $0x28] sm:$0xff] %vm95_vm0, %v1189_v4 }
0x118f   :  { %v1445_v6 = vpop.f32.mrb[24].mxu0 }
0x1190   :  { %v1210_v60 = vadd.f32 %v1445_v6, %v1868_v46  ;;  %v1201_v11 = vpop.f32.mrb[25].mxu0 }
0x1191   :  { %v1202_v61 = vadd.f32 %v1868_v46, %v1201_v11  ;;  %v1446_v13 = vpop.f32.mrb[26].mxu0 }
0x1192   :  { %1242 = vst.msk [vmem:[%s1981_s6 + $0x50] sm:$0xff] %vm95_vm0, %v1210_v60  ;;  %v1213_v62 = vadd.f32 %v1446_v13, %v1868_v46  ;;  %v1204_v63 = vpop.f32.mrb[27].mxu0 }
0x1193   :  { %1240 = vst.msk [vmem:[%s1981_s6 + $0x40] sm:$0xff] %vm95_vm0, %v1202_v61  ;;  %v1205_v0 = vadd.f32 %v1868_v46, %v1204_v63 }
0x1194   :  { %1243 = vst.msk [vmem:[%s1981_s6 + $0x58] sm:$0xff] %vm95_vm0, %v1213_v62  ;;  %v1576_v15 = vpop.eup %1575 }
0x1195   :  { %1241 = vst.msk [vmem:[%s1981_s6 + $0x48] sm:$0xff] %vm95_vm0, %v1205_v0  ;;  %v1578_v24 = vpop.eup %1577  ;;  %v935_v27 = vmul.f32 %v1576_v15, %v1838_v10 }
0x1196   :  { %v936_v12 = vmul.f32 %v1578_v24, %v1841_v17 }
0x11f7   :  { %v940_v16 = vpop.permute.xlu0 %939 }
0x11f8   :  { %v945_v18 = vmul.f32 %v1576_v15, %v940_v16 }
0x11f9   :  { %v942_v25 = vpop.permute.xlu1 %941 }
0x11fa   :  { %949 = vrot.lane.b32.xlu0 %v945_v18, %s1602_s15  ;;  %v946_v26 = vmul.f32 %v1578_v24, %v942_v25 }
0x11fc   :  { %951 = vrot.lane.b32.xlu1 %v946_v26, %s1602_s15 }
0x126c   :  { %v950_v28 = vpop.permute.xlu0 %949 }
0x126d   :  { %v955_v29 = vadd.f32 %v950_v28, %v935_v27 }
0x126e   :  { %v952_v30 = vpop.permute.xlu1 %951 }
0x126f   :  { %1579 = vtanh.f32 %v955_v29  ;;  %v956_v14 = vadd.f32 %v952_v30, %v936_v12 }
0x1271   :  { %1581 = vtanh.f32 %v956_v14 }
0x1279   :  { %v1580_v31 = vpop.eup %1579 }
0x127a   :  { %961 = vrot.lane.b32.xlu0 %v1580_v31, %s1602_s15 }
0x127b   :  { %v1582_v33 = vpop.eup %1581 }
0x127c   :  { %963 = vrot.lane.b32.xlu1 %v1582_v33, %s1602_s15 }
0x12ec   :  { %v962_v32 = vpop.permute.xlu0 %961 }
0x12ed   :  { %v967_v35 = vmul.f32 %v1576_v15, %v962_v32 }
0x12ee   :  { %v964_v34 = vpop.permute.xlu1 %963 }
0x12ef   :  { %v968_v36 = vmul.f32 %v1578_v24, %v964_v34 }
0x12f1   :  { %v969_v37 = vpack.c.bf16 %v968_v36, %v967_v35 }
0x12f3   :  { %971 = vrot.lane.b32.xlu0 %v969_v37, %s1603_s3 }
0x1365   :  { %v972_v10 = vpop.permute.xlu0 %971 }
0x1366   :  { %975 = vst.msk [vmem:[#allocation3 + $0x30] sm:$0xff] %vm251_vm2, %v972_v10  ;;  %1428 = vmatmul.mubr.msk.bf16.vlgmr.msra.gmra.mrb[28].mxu1 %vm251_vm2, %v972_v10 }
0x136d   :  { %v1086_v17 = vld [vmem:[#allocation3 + $0x30] sm:$0xff] }
0x136e   :  { %1447 = vmatprep.mubr.msk.bf16.mxu0 %vm251_vm2, %v1086_v17 }
0x1439   :  { %v1016_v39 = vpop.f32.mrb[28].mxu1 }
0x143a   :  { %v1023_v41 = vadd.f32 %v1016_v39, %v211_v38  ;;  %v1429_v42 = vpop.f32.mrb[29].mxu1 }
0x143b   :  { %v1019_v43 = vpop.f32.mrb[30].mxu1 }
0x143c   :  { %1583 = vtanh.f32 %v1023_v41  ;;  %v1024_v44 = vadd.f32 %v1019_v43, %v214_v40  ;;  %v1430_v45 = vpop.f32.mrb[31].mxu1  ;;  %v1293_v47 = vmul.f32 -1.442695, %v1023_v41 }
0x143e   :  { %1585 = vtanh.f32 %v1024_v44  ;;  %v1294_v49 = vmul.f32 -1.442695, %v1024_v44 }
0x143f   :  { %1587 = vpow2.f32 %v1293_v47 }
0x1440   :  { %1589 = vpow2.f32 %v1294_v49 }
0x1446   :  { %v1584_v48 = vpop.eup %1583 }
0x1447   :  { %1043 = vrot.lane.b32.xlu1 %v1584_v48, %s1602_s15 }
0x1448   :  { %v1586_v20 = vpop.eup %1585 }
0x1449   :  { %1045 = vrot.lane.b32.xlu0 %v1586_v20, %s1602_s15  ;;  %v1588_v19 = vpop.eup %1587 }
0x144a   :  { %v1590_v22 = vpop.eup %1589  ;;  %v1031_v21 = vadd.f32 1.0, %v1588_v19 }
0x144b   :  { %v1032_v23 = vadd.f32 1.0, %v1590_v22 }
0x144c   :  { %1591 = vrcp.f32 %v1031_v21 }
0x144d   :  { %1593 = vrcp.f32 %v1032_v23 }
0x1456   :  { %v1592_v50 = vpop.eup %1591 }
0x1457   :  { %v1594_v53 = vpop.eup %1593  ;;  %v1039_v56 = vmul.f32 %v1592_v50, %v955_v29 }
0x1458   :  { %v1040_v3 = vmul.f32 %v1594_v53, %v956_v14 }
0x14b9   :  { %v1044_v51 = vpop.permute.xlu1 %1043 }
0x14ba   :  { %v1049_v52 = vmul.f32 %v1592_v50, %v1044_v51 }
0x14bb   :  { %v1046_v54 = vpop.permute.xlu0 %1045 }
0x14bc   :  { %1053 = vrot.lane.b32.xlu1 %v1049_v52, %s1602_s15  ;;  %v1050_v55 = vmul.f32 %v1594_v53, %v1046_v54 }
0x14be   :  { %1055 = vrot.lane.b32.xlu0 %v1050_v55, %s1602_s15 }
0x152e   :  { %v1054_v57 = vpop.permute.xlu1 %1053 }
0x152f   :  { %v1059_v58 = vadd.f32 %v1054_v57, %v1039_v56 }
0x1530   :  { %v1056_v59 = vpop.permute.xlu0 %1055 }
0x1531   :  { %1595 = vtanh.f32 %v1059_v58  ;;  %v1060_v4 = vadd.f32 %v1056_v59, %v1040_v3 }
0x1533   :  { %1597 = vtanh.f32 %v1060_v4 }
0x153b   :  { %v1596_v6 = vpop.eup %1595 }
0x153c   :  { %1065 = vrot.lane.b32.xlu1 %v1596_v6, %s1602_s15 }
0x153d   :  { %v1598_v60 = vpop.eup %1597 }
0x153e   :  { %1067 = vrot.lane.b32.xlu0 %v1598_v60, %s1602_s15 }
0x15ae   :  { %v1066_v11 = vpop.permute.xlu1 %1065 }
0x15af   :  { %v1071_v13 = vmul.f32 %v1592_v50, %v1066_v11 }
0x15b0   :  { %v1068_v61 = vpop.permute.xlu0 %1067 }
0x15b1   :  { %v1072_v62 = vmul.f32 %v1594_v53, %v1068_v61 }
0x15b3   :  { %v1073_v63 = vpack.c.bf16 %v1072_v62, %v1071_v13 }
0x15b5   :  { %1075 = vrot.lane.b32.xlu1 %v1073_v63, %s1603_s3 }
0x1627   :  { %v1076_v0 = vpop.permute.xlu1 %1075 }
0x1628   :  { %1079 = vst.msk [vmem:[#allocation3 + $0x38] sm:$0xff] %vm251_vm2, %v1076_v0 }
0x162f   :  { %v1087_v1 = vld [vmem:[#allocation3 + $0x38] sm:$0xff] }
0x1630   :  { %1448 = vmatmul.mubr.msk.bf16.gmra.mrb[28].mxu0 %vm251_vm2, %v1087_v1 }
0x1703   :  { %v1449_v2 = vpop.f32.mrb[28].mxu0 }
0x1704   :  { %v1226_v5 = vadd.f32 %v1449_v2, %v1868_v46  ;;  %v1217_v7 = vpop.f32.mrb[29].mxu0 }
0x1705   :  { %v1218_v8 = vadd.f32 %v1868_v46, %v1217_v7  ;;  %v1450_v9 = vpop.f32.mrb[30].mxu0 }
0x1706   :  { %1246 = vst.msk [vmem:[%s1981_s6 + $0x70] sm:$0xff] %vm95_vm0, %v1226_v5  ;;  %v1229_v15 = vadd.f32 %v1450_v9, %v1868_v46  ;;  %v1220_v16 = vpop.f32.mrb[31].mxu0 }
0x1707   :  { %1244 = vst.msk [vmem:[%s1981_s6 + $0x60] sm:$0xff] %vm95_vm0, %v1218_v8  ;;  %v1221_v18 = vadd.f32 %v1868_v46, %v1220_v16 }
0x1708   :  { %1247 = vst.msk [vmem:[%s1981_s6 + $0x78] sm:$0xff] %vm95_vm0, %v1229_v15 }
0x1709   :  { %1245 = vst.msk [vmem:[%s1981_s6 + $0x68] sm:$0xff] %vm95_vm0, %v1221_v18 }

</bundles_post_ra>
